<compile_context>
chip_gen: v5e
topology: v5e:2x2
jax: 0.10.0
libtpu: 0.0.40
codegen_flags: <defaults>
</compile_context>

<pallas_src>
import functools

import jax
import jax.numpy as jnp
from jax.experimental import pallas as pl
from jax.experimental.pallas import tpu as pltpu

NEG_SLOPE = 0.01  # torch.nn.LeakyReLU default negative_slope


def _round_up(n, m):
    return ((n + m - 1) // m) * m


def _leaky_relu(v):
    return jnp.where(v > 0, v, NEG_SLOPE * v)


def init_params(key, input_dim, latent_dim, hidden_dim=256, dtype=jnp.float32):
    """PyTorch-style params. Weights stored transposed as (in, out); biases (out,)."""
    dims = {
        # encoder
        "e0": (input_dim, input_dim // 2),
        "e1": (input_dim // 2, hidden_dim),
        # attention projections (q/k are mathematically irrelevant for seq_len==1)
        "q": (hidden_dim, hidden_dim),
        "k": (hidden_dim, hidden_dim),
        "v": (hidden_dim, hidden_dim),
        "o": (hidden_dim, hidden_dim),
        # encoder_out
        "eo0": (hidden_dim, input_dim // 8),
        "eo1": (input_dim // 8, latent_dim),
        # shallow decoder
        "s0": (latent_dim, hidden_dim),
        "s1": (hidden_dim, input_dim),
        # deep decoder
        "d0": (latent_dim, input_dim // 4),
        "d1": (input_dim // 4, input_dim // 2),
        "d2": (input_dim // 2, input_dim),
        # regressor
        "r0": (latent_dim, latent_dim // 2),
        "r1": (latent_dim // 2, 1),
    }
    params = {}
    for name, (fi, fo) in dims.items():
        key, kw, kb = jax.random.split(key, 3)
        bound = 1.0 / (fi ** 0.5)
        params[f"w_{name}"] = jax.random.uniform(kw, (fi, fo), dtype, -bound, bound)
        params[f"b_{name}"] = jax.random.uniform(kb, (fo,), dtype, -bound, bound)
    return params


def _pick_bm(B, block_m):
    """Batch-tile size: big tiles amortize the ~0.35us/step overhead, but keep
    tail padding modest and prefer >=2 grid tiles so v7x's two TensorCores both
    get work via dimension_semantics=("parallel",)."""
    bm = max(8, min(_round_up(block_m, 8), _round_up(B, 8)))
    # keep tail padding below ~1/8 of the padded batch
    while bm > 128 and (_round_up(B, bm) - B) * 8 > _round_up(B, bm):
        bm = max(128, bm // 2)
    # ensure >=2 grid tiles when the batch is big enough (v7x megacore)
    if _round_up(B, bm) // bm < 2 and bm >= 256:
        bm = max(128, bm // 2)
    return bm


@functools.partial(jax.jit, static_argnames=("block_m", "matmul_dtype"))
def attention_ae_mid_forward(x, params, *, block_m=512, matmul_dtype=jnp.bfloat16):
    B, input_dim = x.shape
    hidden_dim = params["w_e1"].shape[1]
    latent_dim = params["w_eo1"].shape[1]
    lat_half = params["w_r0"].shape[1]
    i4 = params["w_d0"].shape[1]

    cdt = matmul_dtype

    # ---------------- host-side folding & packing ----------------
    # seq_len == 1 -> softmax over a single key is exactly 1, so
    # MHA(x,x,x) == out_proj(value_proj(x)).  Fold V and O into one matmul
    # (compose in f32, cast once to bf16); Q/K cannot affect the result.
    w_vo_f32 = params["w_v"] @ params["w_o"]
    b_vo = params["b_v"] @ params["w_o"] + params["b_o"]

    # Fused z-heads weight/bias: [shallow L0 | deep L0 | regressor L0], each
    # segment padded to a 128-lane boundary so in-kernel slices are aligned.
    f_segs = [("s0", hidden_dim), ("d0", i4), ("r0", lat_half)]
    f_off = {}
    w_chunks, bf_chunks = [], []
    off = 0
    for name, width in f_segs:
        pad_w = _round_up(width, 128)
        f_off[name] = off
        w_chunks.append(jnp.pad(params[f"w_{name}"], ((0, 0), (0, pad_w - width))))
        bf_chunks.append(jnp.pad(params[f"b_{name}"], (0, pad_w - width)))
        off += pad_w
    w_fused = jnp.concatenate(w_chunks, axis=1).astype(cdt)
    b_fused = jnp.concatenate(bf_chunks)

    # One packed, lane-padded bias array (f32) — single DMA for all biases.
    bias_entries = [
        ("e0", params["b_e0"]), ("e1", params["b_e1"]), ("vo", b_vo),
        ("eo0", params["b_eo0"]), ("eo1", params["b_eo1"]),
        ("fused", b_fused),
        ("s1", params["b_s1"]), ("d1", params["b_d1"]), ("d2", params["b_d2"]),
        ("r1", params["b_r1"]),
    ]
    b_off = {}
    b_chunks = []
    boff = 0
    for name, b in bias_entries:
        w = b.shape[0]
        pad_w = _round_up(w, 128)
        b_off[name] = (boff, w)
        b_chunks.append(jnp.pad(b, (0, pad_w - w)))
        boff += pad_w
    bias_packed = jnp.concatenate(b_chunks)[None, :].astype(jnp.float32)

    # bf16 matmul weights (f32 accumulation happens in the dots).
    w_e0 = params["w_e0"].astype(cdt)
    w_e1 = params["w_e1"].astype(cdt)
    w_vo = w_vo_f32.astype(cdt)
    w_eo0 = params["w_eo0"].astype(cdt)
    w_eo1 = params["w_eo1"].astype(cdt)
    w_s1 = params["w_s1"].astype(cdt)
    w_d1 = params["w_d1"].astype(cdt)
    w_d2 = params["w_d2"].astype(cdt)
    # Final regressor projection stays f32: VPU/XLU reduction, not a 1-lane MXU op.
    w_r1_row = params["w_r1"].reshape(1, lat_half).astype(jnp.float32)

    # ---- lane-dense packed output slab (all segment offsets 128-aligned) ----
    # Segment 0: [ z | pred | zeros ] — pred lives in the pad lanes of the
    # encoded segment when latent_dim leaves room (it does for latent < 128),
    # which removes the former dedicated 128-lane pred segment entirely.
    enc_pad = _round_up(latent_dim, 128)
    dec_pad = _round_up(input_dim, 128)
    pred_in_enc = enc_pad > latent_dim
    out_d1 = enc_pad
    out_d2 = enc_pad + dec_pad
    if pred_in_enc:
        pred_off = latent_dim
        out_pred_seg = None
        out_total = enc_pad + 2 * dec_pad
    else:
        out_pred_seg = enc_pad + 2 * dec_pad
        pred_off = out_pred_seg
        out_total = out_pred_seg + 128

    # Batch tiling: keep the tile large; pad the tail instead of shrinking it.
    bm = _pick_bm(B, block_m)
    B_pad = _round_up(B, bm)
    x_p = jnp.pad(x, ((0, B_pad - B), (0, 0))) if B_pad != B else x
    # Host-side bf16 cast of the input: identical numerics (the kernel cast it
    # before the first matmul anyway), halves the input HBM read.
    x_p = x_p.astype(cdt)
    grid = (B_pad // bm,)

    def kernel(x_ref, we0, we1, wvo, weo0, weo1, wf, ws1, wd1, wd2, wr1,
               b_ref, out_ref):
        def dot(a, w_ref):
            return jnp.dot(a.astype(cdt), w_ref[...],
                           preferred_element_type=jnp.float32)

        def bias(name):
            o, w = b_off[name]
            return b_ref[:, o:o + w]

        x_t = x_ref[...]  # already bf16
        # ---- encoder ----
        h = _leaky_relu(dot(x_t, we0) + bias("e0"))
        h = _leaky_relu(dot(h, we1) + bias("e1"))
        # ---- multi-head self-attention over a length-1 sequence ----
        # softmax over a single key == 1 for every head, so the whole MHA block
        # collapses to the folded value->out projection.
        a = dot(h, wvo) + bias("vo")
        # ---- encoder_out ----
        h = _leaky_relu(dot(a, weo0) + bias("eo0"))
        z = _leaky_relu(dot(h, weo1) + bias("eo1"))
        # ---- fused heads on z: shallow-dec L0 | deep-dec L0 | regressor L0 ----
        fused = dot(z, wf) + bias("fused")
        s0 = _leaky_relu(fused[:, f_off["s0"]:f_off["s0"] + hidden_dim])
        d0 = _leaky_relu(fused[:, f_off["d0"]:f_off["d0"] + i4])
        r0 = _leaky_relu(fused[:, f_off["r0"]:f_off["r0"] + lat_half])
        # ---- shallow decoder tail ----
        d1 = dot(s0, ws1) + bias("s1")
        # ---- deep decoder tail ----
        dd = _leaky_relu(dot(d0, wd1) + bias("d1"))
        d2 = dot(dd, wd2) + bias("d2")
        # ---- regressor tail: (lat_half -> 1) via broadcast-mul + lane reduce ----
        p = jnp.sum(r0 * wr1[...], axis=-1, keepdims=True) + bias("r1")
        p = jnp.maximum(p, 0.0)

        # ---- epilogue: direct 128-aligned, unmasked sub-stores (no full-slab
        # concat temporary) ----
        bm_t = x_t.shape[0]
        odt = out_ref.dtype

        if pred_in_enc:
            parts = [z.astype(odt), p.astype(odt)]
            rem = enc_pad - latent_dim - 1
            if rem:
                parts.append(jnp.zeros((bm_t, rem), odt))
            out_ref[:, 0:enc_pad] = jnp.concatenate(parts, axis=-1)
        else:
            out_ref[:, 0:enc_pad] = z.astype(odt)
            out_ref[:, out_pred_seg:out_pred_seg + 128] = jnp.concatenate(
                [p.astype(odt), jnp.zeros((bm_t, 127), odt)], axis=-1)

        def store_dec(lo, d):
            d = d.astype(odt)
            if dec_pad > input_dim:
                d = jnp.concatenate(
                    [d, jnp.zeros((bm_t, dec_pad - input_dim), odt)], axis=-1)
            out_ref[:, lo:lo + dec_pad] = d

        store_dec(out_d1, d1)
        store_dec(out_d2, d2)

    weights = [w_e0, w_e1, w_vo, w_eo0, w_eo1, w_fused, w_s1, w_d1, w_d2,
               w_r1_row]

    def full_spec(arr):
        nd = arr.ndim
        return pl.BlockSpec(arr.shape, lambda i, _nd=nd: (0,) * _nd)

    in_specs = ([pl.BlockSpec((bm, input_dim), lambda i: (i, 0))]
                + [full_spec(w) for w in weights]
                + [full_spec(bias_packed)])
    out_specs = pl.BlockSpec((bm, out_total), lambda i: (i, 0))

    out = pl.pallas_call(
        kernel,
        out_shape=jax.ShapeDtypeStruct((B_pad, out_total), jnp.float32),
        grid_spec=pltpu.PrefetchScalarGridSpec(
            num_scalar_prefetch=0,
            grid=grid,
            in_specs=in_specs,
            out_specs=out_specs,
        ),
        compiler_params=pltpu.CompilerParams(
            dimension_semantics=("parallel",),
            # Explicit limit with headroom; safe on v5e/v6e (128 MiB physical)
            # and on v7x (64 MiB physical) — do NOT raise this assuming v6e.
            vmem_limit_bytes=32 * 1024 * 1024,
        ),
    )(x_p, *weights, bias_packed)

    out = out[:B]
    encoded = out[:, 0:latent_dim]
    decoded1 = out[:, out_d1:out_d1 + input_dim]
    decoded2 = out[:, out_d2:out_d2 + input_dim]
    pred = out[:, pred_off:pred_off + 1]
    return encoded, decoded1, decoded2, pred


def _reference_forward(x, params, num_heads=4, matmul_dtype=jnp.bfloat16):
    """Plain-JAX reference reproducing the PyTorch forward (FULL MHA math,
    seq_len == 1, separate V and O projections), with the same bf16-operand /
    f32-accumulation convention.  Verifies both the softmax==1 shortcut and
    the host-side V@O weight folding."""
    cdt = matmul_dtype
    lk = lambda v: jnp.where(v > 0, v, NEG_SLOPE * v)

    def lin(a, w, b):
        return jnp.dot(a.astype(cdt), w.astype(cdt),
                       preferred_element_type=jnp.float32) + b

    h = lk(lin(x, params["w_e0"], params["b_e0"]))
    h = lk(lin(h, params["w_e1"], params["b_e1"]))

    B, H = h.shape
    hd = H // num_heads
    q = lin(h, params["w_q"], params["b_q"]).reshape(B, num_heads, hd)
    k = lin(h, params["w_k"], params["b_k"]).reshape(B, num_heads, hd)
    v = lin(h, params["w_v"], params["b_v"]).reshape(B, num_heads, hd)
    scores = jnp.sum(q * k, axis=-1, keepdims=True) / (hd ** 0.5)   # (B, nh, 1)
    attn = jax.nn.softmax(scores[..., None], axis=-1)               # == 1.0
    ctx = (attn[..., 0] * v).reshape(B, H)
    a = lin(ctx, params["w_o"], params["b_o"])

    h = lk(lin(a, params["w_eo0"], params["b_eo0"]))
    z = lk(lin(h, params["w_eo1"], params["b_eo1"]))

    d1 = lin(lk(lin(z, params["w_s0"], params["b_s0"])),
             params["w_s1"], params["b_s1"])
    dd = lk(lin(z, params["w_d0"], params["b_d0"]))
    dd = lk(lin(dd, params["w_d1"], params["b_d1"]))
    d2 = lin(dd, params["w_d2"], params["b_d2"])
    r = lk(lin(z, params["w_r0"], params["b_r0"]))
    p = jnp.maximum(r @ params["w_r1"] + params["b_r1"], 0.0)  # f32, like kernel
    return z, d1, d2, p


if __name__ == "__main__":
    input_dim = 256
    latent_dim = 32
    hidden_dim = 256   # 128 * 2, the PyTorch default
    num_heads = 4
    batch = 8

    key = jax.random.PRNGKey(0)
    kx, kp = jax.random.split(key)
    x = jax.random.normal(kx, (batch, input_dim), jnp.float32)
    params = init_params(kp, input_dim, latent_dim, hidden_dim)

    outs = attention_ae_mid_forward(x, params)
    outs = jax.block_until_ready(outs)

    refs = _reference_forward(x, params, num_heads=num_heads)
    names = ("encoded", "decoded1", "decoded2", "pred")
    for name, o, r in zip(names, outs, refs):
        assert o.shape == r.shape, f"{name}: shape {o.shape} vs {r.shape}"
        assert jnp.allclose(o, r, rtol=5e-3, atol=5e-3), f"{name}: mismatch vs reference"

    print("KERNEL_OK")
</pallas_src>

<mosaic_0001>
module attributes {stable_mosaic.version = 11 : i64} {
  func.func @kernel(%arg0: i32, %arg1: memref<8x256xbf16, #tpu.memory_space<vmem>>, %arg2: memref<256x128xbf16, #tpu.memory_space<vmem>>, %arg3: memref<128x256xbf16, #tpu.memory_space<vmem>>, %arg4: memref<256x256xbf16, #tpu.memory_space<vmem>>, %arg5: memref<256x32xbf16, #tpu.memory_space<vmem>>, %arg6: memref<32x32xbf16, #tpu.memory_space<vmem>>, %arg7: memref<32x512xbf16, #tpu.memory_space<vmem>>, %arg8: memref<256x256xbf16, #tpu.memory_space<vmem>>, %arg9: memref<64x128xbf16, #tpu.memory_space<vmem>>, %arg10: memref<128x256xbf16, #tpu.memory_space<vmem>>, %arg11: memref<1x16xf32, #tpu.memory_space<vmem>>, %arg12: memref<1x2176xf32, #tpu.memory_space<vmem>>, %arg13: memref<8x640xf32, #tpu.memory_space<vmem>>) attributes {dimension_semantics = [#tpu.dimension_semantics<parallel>], iteration_bounds = array<i64: 1>, scalar_prefetch = 0 : i64, scratch_operands = 0 : i64, tpu.core_type = #tpu.core_type<tc>, window_params = [{transform_indices = @transform_0, window_bounds = array<i64: 8, 256>}, {pipeline_mode = #tpu.pipeline_mode<synchronous>, transform_indices = @transform_1, window_bounds = array<i64: 256, 128>}, {pipeline_mode = #tpu.pipeline_mode<synchronous>, transform_indices = @transform_2, window_bounds = array<i64: 128, 256>}, {pipeline_mode = #tpu.pipeline_mode<synchronous>, transform_indices = @transform_3, window_bounds = array<i64: 256, 256>}, {pipeline_mode = #tpu.pipeline_mode<synchronous>, transform_indices = @transform_4, window_bounds = array<i64: 256, 32>}, {pipeline_mode = #tpu.pipeline_mode<synchronous>, transform_indices = @transform_5, window_bounds = array<i64: 32, 32>}, {pipeline_mode = #tpu.pipeline_mode<synchronous>, transform_indices = @transform_6, window_bounds = array<i64: 32, 512>}, {pipeline_mode = #tpu.pipeline_mode<synchronous>, transform_indices = @transform_7, window_bounds = array<i64: 256, 256>}, {pipeline_mode = #tpu.pipeline_mode<synchronous>, transform_indices = @transform_8, window_bounds = array<i64: 64, 128>}, {pipeline_mode = #tpu.pipeline_mode<synchronous>, transform_indices = @transform_9, window_bounds = array<i64: 128, 256>}, {pipeline_mode = #tpu.pipeline_mode<synchronous>, transform_indices = @transform_10, window_bounds = array<i64: 1, 16>}, {pipeline_mode = #tpu.pipeline_mode<synchronous>, transform_indices = @transform_11, window_bounds = array<i64: 1, 2176>}, {transform_indices = @transform_12, window_bounds = array<i64: 8, 640>}]} {
    %c0 = arith.constant 0 : index
    %c0_0 = arith.constant 0 : index
    %0 = vector.load %arg1[%c0, %c0_0] : memref<8x256xbf16, #tpu.memory_space<vmem>>, vector<8x256xbf16>
    %c0_1 = arith.constant 0 : index
    %c0_2 = arith.constant 0 : index
    %1 = vector.load %arg2[%c0_1, %c0_2] : memref<256x128xbf16, #tpu.memory_space<vmem>>, vector<256x128xbf16>
    %cst = arith.constant dense<0.000000e+00> : vector<8x128xf32>
    %2 = tpu.matmul %0, %1, %cst {dimension_numbers = #tpu.dot_dimension_numbers<[1], [0], [0], [1], [0, 0, 1, 1], [], []>} : vector<8x256xbf16>, vector<256x128xbf16>, vector<8x128xf32> -> vector<8x128xf32>
    %c0_3 = arith.constant 0 : index
    %c0_4 = arith.constant 0 : index
    %3 = vector.load %arg12[%c0_3, %c0_4] : memref<1x2176xf32, #tpu.memory_space<vmem>>, vector<1x128xf32>
    %4 = vector.broadcast %3 : vector<1x128xf32> to vector<8x128xf32>
    %5 = arith.addf %2, %4 : vector<8x128xf32>
    %cst_5 = arith.constant 0.000000e+00 : f32
    %6 = vector.broadcast %cst_5 : f32 to vector<8x128xf32>
    %7 = arith.cmpf ogt, %5, %6 : vector<8x128xf32>
    %cst_6 = arith.constant 0.00999999977 : f32
    %8 = vector.broadcast %cst_6 : f32 to vector<8x128xf32>
    %9 = arith.mulf %8, %5 : vector<8x128xf32>
    %10 = arith.select %7, %5, %9 : vector<8x128xi1>, vector<8x128xf32>
    %11 = arith.truncf %10 : vector<8x128xf32> to vector<8x128xbf16>
    %c0_7 = arith.constant 0 : index
    %c0_8 = arith.constant 0 : index
    %12 = vector.load %arg3[%c0_7, %c0_8] : memref<128x256xbf16, #tpu.memory_space<vmem>>, vector<128x256xbf16>
    %cst_9 = arith.constant dense<0.000000e+00> : vector<8x256xf32>
    %13 = tpu.matmul %11, %12, %cst_9 {dimension_numbers = #tpu.dot_dimension_numbers<[1], [0], [0], [1], [0, 0, 1, 1], [], []>} : vector<8x128xbf16>, vector<128x256xbf16>, vector<8x256xf32> -> vector<8x256xf32>
    %c0_10 = arith.constant 0 : index
    %c128 = arith.constant 128 : index
    %14 = vector.load %arg12[%c0_10, %c128] : memref<1x2176xf32, #tpu.memory_space<vmem>>, vector<1x256xf32>
    %15 = vector.broadcast %14 : vector<1x256xf32> to vector<8x256xf32>
    %16 = arith.addf %13, %15 : vector<8x256xf32>
    %cst_11 = arith.constant 0.000000e+00 : f32
    %17 = vector.broadcast %cst_11 : f32 to vector<8x256xf32>
    %18 = arith.cmpf ogt, %16, %17 : vector<8x256xf32>
    %cst_12 = arith.constant 0.00999999977 : f32
    %19 = vector.broadcast %cst_12 : f32 to vector<8x256xf32>
    %20 = arith.mulf %19, %16 : vector<8x256xf32>
    %21 = arith.select %18, %16, %20 : vector<8x256xi1>, vector<8x256xf32>
    %22 = arith.truncf %21 : vector<8x256xf32> to vector<8x256xbf16>
    %c0_13 = arith.constant 0 : index
    %c0_14 = arith.constant 0 : index
    %23 = vector.load %arg4[%c0_13, %c0_14] : memref<256x256xbf16, #tpu.memory_space<vmem>>, vector<256x256xbf16>
    %cst_15 = arith.constant dense<0.000000e+00> : vector<8x256xf32>
    %24 = tpu.matmul %22, %23, %cst_15 {dimension_numbers = #tpu.dot_dimension_numbers<[1], [0], [0], [1], [0, 0, 1, 1], [], []>} : vector<8x256xbf16>, vector<256x256xbf16>, vector<8x256xf32> -> vector<8x256xf32>
    %c0_16 = arith.constant 0 : index
    %c384 = arith.constant 384 : index
    %25 = vector.load %arg12[%c0_16, %c384] : memref<1x2176xf32, #tpu.memory_space<vmem>>, vector<1x256xf32>
    %26 = vector.broadcast %25 : vector<1x256xf32> to vector<8x256xf32>
    %27 = arith.addf %24, %26 : vector<8x256xf32>
    %28 = arith.truncf %27 : vector<8x256xf32> to vector<8x256xbf16>
    %c0_17 = arith.constant 0 : index
    %c0_18 = arith.constant 0 : index
    %29 = vector.load %arg5[%c0_17, %c0_18] : memref<256x32xbf16, #tpu.memory_space<vmem>>, vector<256x32xbf16>
    %cst_19 = arith.constant dense<0.000000e+00> : vector<8x32xf32>
    %30 = tpu.matmul %28, %29, %cst_19 {dimension_numbers = #tpu.dot_dimension_numbers<[1], [0], [0], [1], [0, 0, 1, 1], [], []>} : vector<8x256xbf16>, vector<256x32xbf16>, vector<8x32xf32> -> vector<8x32xf32>
    %c0_20 = arith.constant 0 : index
    %c640 = arith.constant 640 : index
    %31 = vector.load %arg12[%c0_20, %c640] : memref<1x2176xf32, #tpu.memory_space<vmem>>, vector<1x32xf32>
    %32 = vector.broadcast %31 : vector<1x32xf32> to vector<8x32xf32>
    %33 = arith.addf %30, %32 : vector<8x32xf32>
    %cst_21 = arith.constant 0.000000e+00 : f32
    %34 = vector.broadcast %cst_21 : f32 to vector<8x32xf32>
    %35 = arith.cmpf ogt, %33, %34 : vector<8x32xf32>
    %cst_22 = arith.constant 0.00999999977 : f32
    %36 = vector.broadcast %cst_22 : f32 to vector<8x32xf32>
    %37 = arith.mulf %36, %33 : vector<8x32xf32>
    %38 = arith.select %35, %33, %37 : vector<8x32xi1>, vector<8x32xf32>
    %39 = arith.truncf %38 : vector<8x32xf32> to vector<8x32xbf16>
    %c0_23 = arith.constant 0 : index
    %c0_24 = arith.constant 0 : index
    %40 = vector.load %arg6[%c0_23, %c0_24] : memref<32x32xbf16, #tpu.memory_space<vmem>>, vector<32x32xbf16>
    %cst_25 = arith.constant dense<0.000000e+00> : vector<8x32xf32>
    %41 = tpu.matmul %39, %40, %cst_25 {dimension_numbers = #tpu.dot_dimension_numbers<[1], [0], [0], [1], [0, 0, 1, 1], [], []>} : vector<8x32xbf16>, vector<32x32xbf16>, vector<8x32xf32> -> vector<8x32xf32>
    %c0_26 = arith.constant 0 : index
    %c768 = arith.constant 768 : index
    %42 = vector.load %arg12[%c0_26, %c768] : memref<1x2176xf32, #tpu.memory_space<vmem>>, vector<1x32xf32>
    %43 = vector.broadcast %42 : vector<1x32xf32> to vector<8x32xf32>
    %44 = arith.addf %41, %43 : vector<8x32xf32>
    %cst_27 = arith.constant 0.000000e+00 : f32
    %45 = vector.broadcast %cst_27 : f32 to vector<8x32xf32>
    %46 = arith.cmpf ogt, %44, %45 : vector<8x32xf32>
    %cst_28 = arith.constant 0.00999999977 : f32
    %47 = vector.broadcast %cst_28 : f32 to vector<8x32xf32>
    %48 = arith.mulf %47, %44 : vector<8x32xf32>
    %49 = arith.select %46, %44, %48 : vector<8x32xi1>, vector<8x32xf32>
    %50 = arith.truncf %49 : vector<8x32xf32> to vector<8x32xbf16>
    %c0_29 = arith.constant 0 : index
    %c0_30 = arith.constant 0 : index
    %51 = vector.load %arg7[%c0_29, %c0_30] : memref<32x512xbf16, #tpu.memory_space<vmem>>, vector<32x512xbf16>
    %cst_31 = arith.constant dense<0.000000e+00> : vector<8x512xf32>
    %52 = tpu.matmul %50, %51, %cst_31 {dimension_numbers = #tpu.dot_dimension_numbers<[1], [0], [0], [1], [0, 0, 1, 1], [], []>} : vector<8x32xbf16>, vector<32x512xbf16>, vector<8x512xf32> -> vector<8x512xf32>
    %c0_32 = arith.constant 0 : index
    %c896 = arith.constant 896 : index
    %53 = vector.load %arg12[%c0_32, %c896] : memref<1x2176xf32, #tpu.memory_space<vmem>>, vector<1x512xf32>
    %54 = vector.broadcast %53 : vector<1x512xf32> to vector<8x512xf32>
    %55 = arith.addf %52, %54 : vector<8x512xf32>
    %56 = vector.extract_strided_slice %55 {offsets = [0, 0], sizes = [8, 256], strides = [1, 1]} : vector<8x512xf32> to vector<8x256xf32>
    %cst_33 = arith.constant 0.000000e+00 : f32
    %57 = vector.broadcast %cst_33 : f32 to vector<8x256xf32>
    %58 = arith.cmpf ogt, %56, %57 : vector<8x256xf32>
    %cst_34 = arith.constant 0.00999999977 : f32
    %59 = vector.broadcast %cst_34 : f32 to vector<8x256xf32>
    %60 = arith.mulf %59, %56 : vector<8x256xf32>
    %61 = arith.select %58, %56, %60 : vector<8x256xi1>, vector<8x256xf32>
    %62 = vector.extract_strided_slice %55 {offsets = [0, 256], sizes = [8, 64], strides = [1, 1]} : vector<8x512xf32> to vector<8x64xf32>
    %cst_35 = arith.constant 0.000000e+00 : f32
    %63 = vector.broadcast %cst_35 : f32 to vector<8x64xf32>
    %64 = arith.cmpf ogt, %62, %63 : vector<8x64xf32>
    %cst_36 = arith.constant 0.00999999977 : f32
    %65 = vector.broadcast %cst_36 : f32 to vector<8x64xf32>
    %66 = arith.mulf %65, %62 : vector<8x64xf32>
    %67 = arith.select %64, %62, %66 : vector<8x64xi1>, vector<8x64xf32>
    %68 = vector.extract_strided_slice %55 {offsets = [0, 384], sizes = [8, 16], strides = [1, 1]} : vector<8x512xf32> to vector<8x16xf32>
    %cst_37 = arith.constant 0.000000e+00 : f32
    %69 = vector.broadcast %cst_37 : f32 to vector<8x16xf32>
    %70 = arith.cmpf ogt, %68, %69 : vector<8x16xf32>
    %cst_38 = arith.constant 0.00999999977 : f32
    %71 = vector.broadcast %cst_38 : f32 to vector<8x16xf32>
    %72 = arith.mulf %71, %68 : vector<8x16xf32>
    %73 = arith.select %70, %68, %72 : vector<8x16xi1>, vector<8x16xf32>
    %74 = arith.truncf %61 : vector<8x256xf32> to vector<8x256xbf16>
    %c0_39 = arith.constant 0 : index
    %c0_40 = arith.constant 0 : index
    %75 = vector.load %arg8[%c0_39, %c0_40] : memref<256x256xbf16, #tpu.memory_space<vmem>>, vector<256x256xbf16>
    %cst_41 = arith.constant dense<0.000000e+00> : vector<8x256xf32>
    %76 = tpu.matmul %74, %75, %cst_41 {dimension_numbers = #tpu.dot_dimension_numbers<[1], [0], [0], [1], [0, 0, 1, 1], [], []>} : vector<8x256xbf16>, vector<256x256xbf16>, vector<8x256xf32> -> vector<8x256xf32>
    %c0_42 = arith.constant 0 : index
    %c1408 = arith.constant 1408 : index
    %77 = vector.load %arg12[%c0_42, %c1408] : memref<1x2176xf32, #tpu.memory_space<vmem>>, vector<1x256xf32>
    %78 = vector.broadcast %77 : vector<1x256xf32> to vector<8x256xf32>
    %79 = arith.addf %76, %78 : vector<8x256xf32>
    %80 = arith.truncf %67 : vector<8x64xf32> to vector<8x64xbf16>
    %c0_43 = arith.constant 0 : index
    %c0_44 = arith.constant 0 : index
    %81 = vector.load %arg9[%c0_43, %c0_44] : memref<64x128xbf16, #tpu.memory_space<vmem>>, vector<64x128xbf16>
    %cst_45 = arith.constant dense<0.000000e+00> : vector<8x128xf32>
    %82 = tpu.matmul %80, %81, %cst_45 {dimension_numbers = #tpu.dot_dimension_numbers<[1], [0], [0], [1], [0, 0, 1, 1], [], []>} : vector<8x64xbf16>, vector<64x128xbf16>, vector<8x128xf32> -> vector<8x128xf32>
    %c0_46 = arith.constant 0 : index
    %c1664 = arith.constant 1664 : index
    %83 = vector.load %arg12[%c0_46, %c1664] : memref<1x2176xf32, #tpu.memory_space<vmem>>, vector<1x128xf32>
    %84 = vector.broadcast %83 : vector<1x128xf32> to vector<8x128xf32>
    %85 = arith.addf %82, %84 : vector<8x128xf32>
    %cst_47 = arith.constant 0.000000e+00 : f32
    %86 = vector.broadcast %cst_47 : f32 to vector<8x128xf32>
    %87 = arith.cmpf ogt, %85, %86 : vector<8x128xf32>
    %cst_48 = arith.constant 0.00999999977 : f32
    %88 = vector.broadcast %cst_48 : f32 to vector<8x128xf32>
    %89 = arith.mulf %88, %85 : vector<8x128xf32>
    %90 = arith.select %87, %85, %89 : vector<8x128xi1>, vector<8x128xf32>
    %91 = arith.truncf %90 : vector<8x128xf32> to vector<8x128xbf16>
    %c0_49 = arith.constant 0 : index
    %c0_50 = arith.constant 0 : index
    %92 = vector.load %arg10[%c0_49, %c0_50] : memref<128x256xbf16, #tpu.memory_space<vmem>>, vector<128x256xbf16>
    %cst_51 = arith.constant dense<0.000000e+00> : vector<8x256xf32>
    %93 = tpu.matmul %91, %92, %cst_51 {dimension_numbers = #tpu.dot_dimension_numbers<[1], [0], [0], [1], [0, 0, 1, 1], [], []>} : vector<8x128xbf16>, vector<128x256xbf16>, vector<8x256xf32> -> vector<8x256xf32>
    %c0_52 = arith.constant 0 : index
    %c1792 = arith.constant 1792 : index
    %94 = vector.load %arg12[%c0_52, %c1792] : memref<1x2176xf32, #tpu.memory_space<vmem>>, vector<1x256xf32>
    %95 = vector.broadcast %94 : vector<1x256xf32> to vector<8x256xf32>
    %96 = arith.addf %93, %95 : vector<8x256xf32>
    %c0_53 = arith.constant 0 : index
    %c0_54 = arith.constant 0 : index
    %97 = vector.load %arg11[%c0_53, %c0_54] : memref<1x16xf32, #tpu.memory_space<vmem>>, vector<1x16xf32>
    %98 = vector.broadcast %97 : vector<1x16xf32> to vector<8x16xf32>
    %99 = arith.mulf %73, %98 : vector<8x16xf32>
    %cst_55 = arith.constant dense<0.000000e+00> : vector<8xf32>
    %100 = vector.multi_reduction <add>, %99, %cst_55 [1] : vector<8x16xf32> to vector<8xf32>
    %101 = vector.shape_cast %100 : vector<8xf32> to vector<8x1xf32>
    %c0_56 = arith.constant 0 : index
    %c2048 = arith.constant 2048 : index
    %102 = vector.load %arg12[%c0_56, %c2048] : memref<1x2176xf32, #tpu.memory_space<vmem>>, vector<1x1xf32>
    %103 = vector.broadcast %102 : vector<1x1xf32> to vector<8x1xf32>
    %104 = arith.addf %101, %103 : vector<8x1xf32>
    %cst_57 = arith.constant 0.000000e+00 : f32
    %105 = vector.broadcast %cst_57 : f32 to vector<8x1xf32>
    %106 = arith.maximumf %104, %105 : vector<8x1xf32>
    %cst_58 = arith.constant 0.000000e+00 : f32
    %107 = vector.broadcast %cst_58 : f32 to vector<8x95xf32>
    %108 = tpu.concatenate %49, %106, %107 in 1 : vector<8x32xf32>, vector<8x1xf32>, vector<8x95xf32> -> vector<8x128xf32>
    %c0_59 = arith.constant 0 : index
    %c0_60 = arith.constant 0 : index
    %109 = vector.load %arg13[%c0_59, %c0_60] : memref<8x640xf32, #tpu.memory_space<vmem>>, vector<8x128xf32>
    tpu.vector_store %arg13[%c0_59, %c0_60], %108 {strides = array<i32>} : memref<8x640xf32, #tpu.memory_space<vmem>>, vector<8x128xf32>,
    %c0_61 = arith.constant 0 : index
    %c128_62 = arith.constant 128 : index
    %110 = vector.load %arg13[%c0_61, %c128_62] : memref<8x640xf32, #tpu.memory_space<vmem>>, vector<8x256xf32>
    tpu.vector_store %arg13[%c0_61, %c128_62], %79 {strides = array<i32>} : memref<8x640xf32, #tpu.memory_space<vmem>>, vector<8x256xf32>,
    %c0_63 = arith.constant 0 : index
    %c384_64 = arith.constant 384 : index
    %111 = vector.load %arg13[%c0_63, %c384_64] : memref<8x640xf32, #tpu.memory_space<vmem>>, vector<8x256xf32>
    tpu.vector_store %arg13[%c0_63, %c384_64], %96 {strides = array<i32>} : memref<8x640xf32, #tpu.memory_space<vmem>>, vector<8x256xf32>,
    return
  }
  func.func @transform_0(%arg0: i32) -> (i32, i32) {
    %c0_i32 = arith.constant 0 : i32
    %c0_i32_0 = arith.constant 0 : i32
    return %arg0, %c0_i32 : i32, i32
  }
  func.func @transform_1(%arg0: i32) -> (i32, i32) {
    %c0_i32 = arith.constant 0 : i32
    %c0_i32_0 = arith.constant 0 : i32
    %c0_i32_1 = arith.constant 0 : i32
    return %c0_i32, %c0_i32_0 : i32, i32
  }
  func.func @transform_2(%arg0: i32) -> (i32, i32) {
    %c0_i32 = arith.constant 0 : i32
    %c0_i32_0 = arith.constant 0 : i32
    %c0_i32_1 = arith.constant 0 : i32
    return %c0_i32, %c0_i32_0 : i32, i32
  }
  func.func @transform_3(%arg0: i32) -> (i32, i32) {
    %c0_i32 = arith.constant 0 : i32
    %c0_i32_0 = arith.constant 0 : i32
    %c0_i32_1 = arith.constant 0 : i32
    return %c0_i32, %c0_i32_0 : i32, i32
  }
  func.func @transform_4(%arg0: i32) -> (i32, i32) {
    %c0_i32 = arith.constant 0 : i32
    %c0_i32_0 = arith.constant 0 : i32
    %c0_i32_1 = arith.constant 0 : i32
    return %c0_i32, %c0_i32_0 : i32, i32
  }
  func.func @transform_5(%arg0: i32) -> (i32, i32) {
    %c0_i32 = arith.constant 0 : i32
    %c0_i32_0 = arith.constant 0 : i32
    %c0_i32_1 = arith.constant 0 : i32
    return %c0_i32, %c0_i32_0 : i32, i32
  }
  func.func @transform_6(%arg0: i32) -> (i32, i32) {
    %c0_i32 = arith.constant 0 : i32
    %c0_i32_0 = arith.constant 0 : i32
    %c0_i32_1 = arith.constant 0 : i32
    return %c0_i32, %c0_i32_0 : i32, i32
  }
  func.func @transform_7(%arg0: i32) -> (i32, i32) {
    %c0_i32 = arith.constant 0 : i32
    %c0_i32_0 = arith.constant 0 : i32
    %c0_i32_1 = arith.constant 0 : i32
    return %c0_i32, %c0_i32_0 : i32, i32
  }
  func.func @transform_8(%arg0: i32) -> (i32, i32) {
    %c0_i32 = arith.constant 0 : i32
    %c0_i32_0 = arith.constant 0 : i32
    %c0_i32_1 = arith.constant 0 : i32
    return %c0_i32, %c0_i32_0 : i32, i32
  }
  func.func @transform_9(%arg0: i32) -> (i32, i32) {
    %c0_i32 = arith.constant 0 : i32
    %c0_i32_0 = arith.constant 0 : i32
    %c0_i32_1 = arith.constant 0 : i32
    return %c0_i32, %c0_i32_0 : i32, i32
  }
  func.func @transform_10(%arg0: i32) -> (i32, i32) {
    %c0_i32 = arith.constant 0 : i32
    %c0_i32_0 = arith.constant 0 : i32
    %c0_i32_1 = arith.constant 0 : i32
    return %c0_i32, %c0_i32_0 : i32, i32
  }
  func.func @transform_11(%arg0: i32) -> (i32, i32) {
    %c0_i32 = arith.constant 0 : i32
    %c0_i32_0 = arith.constant 0 : i32
    %c0_i32_1 = arith.constant 0 : i32
    return %c0_i32, %c0_i32_0 : i32, i32
  }
  func.func @transform_12(%arg0: i32) -> (i32, i32) {
    %c0_i32 = arith.constant 0 : i32
    %c0_i32_0 = arith.constant 0 : i32
    return %arg0, %c0_i32 : i32, i32
  }
}

</mosaic_0001>

<bundles_post_ra>
// kernel: custom-call
= control target key start
LH: loop header
LB: loop body
LE: loop exit
PB: predicated region body
PF: predicated region fallthrough
CT: control target
= control target key end

     0   :  { %s6_s0 = inlined_call_operand.vmem [shape: f32[2176], index: 0, kind: output, shape index: {}]  }

// kernel: attention_ae_mid_forward.1
= control target key start
LH: loop header
LB: loop body
LE: loop exit
PB: predicated region body
PF: predicated region fallthrough
CT: control target
= control target key end

     0   :  { %vm782_vm4 = vcmask 261120   ;;  %vm1371_vm7 = vcmask 130048   ;;  %vm1217_vm11 = vcmask 523264   ;;  %s2120_s15 = smov 32   ;;  %vm1386_vm13 = vcmask 269312   ;;  %s2986_s1 = inlined_call_operand.vmem [shape: bf16[256,128], index: 1, kind: input, shape index: {}]   ;;  %s2987_s2 = inlined_call_operand.vmem [shape: bf16[128,256], index: 2, kind: input, shape index: {}]   ;;  %s2988_s11 = inlined_call_operand.vmem [shape: f32[1,2176], index: 11, kind: input, shape index: {}]   ;;  %s2989_s0 = inlined_call_operand.vmem [shape: bf16[8,256], index: 0, kind: input, shape index: {}]   ;;  %s2990_s3 = inlined_call_operand.vmem [shape: bf16[256,256], index: 3, kind: input, shape index: {}]   ;;  %s2991_s4 = inlined_call_operand.vmem [shape: bf16[256,32], index: 4, kind: input, shape index: {}]   ;;  %s2992_s5 = inlined_call_operand.vmem [shape: bf16[32,32], index: 5, kind: input, shape index: {}]   ;;  %s2993_s6 = inlined_call_operand.vmem [shape: bf16[32,512], index: 6, kind: input, shape index: {}]   ;;  %s2994_s7 = inlined_call_operand.vmem [shape: bf16[256,256], index: 7, kind: input, shape index: {}]   ;;  %s2995_s10 = inlined_call_operand.vmem [shape: f32[1,16], index: 10, kind: input, shape index: {}]   ;;  %s2996_s8 = inlined_call_operand.vmem [shape: bf16[64,128], index: 8, kind: input, shape index: {}]   ;;  %s2997_s9 = inlined_call_operand.vmem [shape: bf16[128,256], index: 9, kind: input, shape index: {}]   ;;  %s2998_s12 = inlined_call_operand.vmem [shape: f32[8,640], index: 12, kind: output, shape index: {}]  }
   0x1   :  { %v1978_v0 = vld [vmem:[%s2986_s1 + $0x38] sm:$0xff]  ;;  %v1977_v2 = vld [vmem:[%s2986_s1 + $0x30] sm:$0xff]  ;;  %v1976_v4 = vld [vmem:[%s2986_s1 + $0x28] sm:$0xff] }
   0x2   :  { %v1986_v1 = vld [vmem:[%s2986_s1 + $0x78] sm:$0xff]  ;;  %182 = vmatpush.bf16.msra.mxu0 %v1978_v0  ;;  %v1985_v3 = vld [vmem:[%s2986_s1 + $0x70] sm:$0xff]  ;;  %v1984_v5 = vld [vmem:[%s2986_s1 + $0x68] sm:$0xff] }
   0x3   :  { %195 = vmatpush.bf16.msra.mxu1 %v1986_v1  ;;  %v1519_v6 = vld [vmem:[%s2987_s2 + $0x70] sm:$0xf]  ;;  %v2002_v7 = vld [vmem:[%s2987_s2 + $0x74] sm:$0xf0]  ;;  %v2001_v8 = vld [vmem:[%s2987_s2 + $0x74] sm:$0xf] }
   0x4   :  { %v1521_v9 = vld [vmem:[%s2987_s2 + $0x78] sm:$0xf0]  ;;  %v1520_v10 = vor.u32 %v2002_v7, %v1519_v6  ;;  %v1511_v12 = vld [vmem:[%s2987_s2 + $0x60] sm:$0xf]  ;;  %v2000_v13 = vld [vmem:[%s2987_s2 + $0x64] sm:$0xf0] }
   0x5   :  { %v1524_v11 = vor.u32 %v2001_v8, %v1521_v9  ;;  %v1999_v14 = vld [vmem:[%s2987_s2 + $0x64] sm:$0xf]  ;;  %v1513_v15 = vld [vmem:[%s2987_s2 + $0x68] sm:$0xf0]  ;;  %v1512_v18 = vor.u32 %v2000_v13, %v1511_v12  ;;  %v1503_v20 = vld [vmem:[%s2987_s2 + $0x50] sm:$0xf] }
   0x6   :  { %183 = vmatpush.bf16.msra.mxu0 %v1977_v2  ;;  %v1975_v16 = vld [vmem:[%s2986_s1 + $0x20] sm:$0xff]  ;;  %314 = vmatpush.bf16.msra.mxu2 %v1520_v10  ;;  %v1516_v19 = vor.u32 %v1999_v14, %v1513_v15  ;;  %v1998_v21 = vld [vmem:[%s2987_s2 + $0x54] sm:$0xf0]  ;;  %v1997_v22 = vld [vmem:[%s2987_s2 + $0x54] sm:$0xf] }
   0x7   :  { %196 = vmatpush.bf16.msra.mxu1 %v1985_v3  ;;  %v1983_v17 = vld [vmem:[%s2986_s1 + $0x60] sm:$0xff]  ;;  %327 = vmatpush.bf16.msra.mxu3 %v1524_v11  ;;  %v1505_v23 = vld [vmem:[%s2987_s2 + $0x58] sm:$0xf0]  ;;  %v1504_v27 = vor.u32 %v1998_v21, %v1503_v20  ;;  %v1996_v29 = vld [vmem:[%s2987_s2 + $0x44] sm:$0xf0] }
   0x8   :  { %v1974_v24 = vld [vmem:[%s2986_s1 + $0x18] sm:$0xff]  ;;  %v1495_v26 = vld [vmem:[%s2987_s2 + $0x40] sm:$0xf]  ;;  %v1508_v28 = vor.u32 %v1997_v22, %v1505_v23  ;;  %v1995_v30 = vld [vmem:[%s2987_s2 + $0x44] sm:$0xf] }
   0x9   :  { %v1982_v25 = vld [vmem:[%s2986_s1 + $0x58] sm:$0xff]  ;;  %v1497_v31 = vld [vmem:[%s2987_s2 + $0x48] sm:$0xf0]  ;;  %v1973_v32 = vld [vmem:[%s2986_s1 + $0x10] sm:$0xff]  ;;  %v1496_v34 = vor.u32 %v1996_v29, %v1495_v26 }
   0xa   :  { %184 = vmatpush.bf16.msra.mxu0 %v1976_v4  ;;  %315 = vmatpush.bf16.msra.mxu2 %v1512_v18  ;;  %v1981_v33 = vld [vmem:[%s2986_s1 + $0x50] sm:$0xff]  ;;  %v1500_v35 = vor.u32 %v1995_v30, %v1497_v31  ;;  %v1994_v37 = vld [vmem:[%s2987_s2 + $0x34] sm:$0xf0]  ;;  %v1489_v39 = vld [vmem:[%s2987_s2 + $0x38] sm:$0xf0] }
   0xb   :  { %197 = vmatpush.bf16.msra.mxu1 %v1984_v5  ;;  %328 = vmatpush.bf16.msra.mxu3 %v1516_v19  ;;  %v1487_v36 = vld [vmem:[%s2987_s2 + $0x30] sm:$0xf]  ;;  %v1993_v38 = vld [vmem:[%s2987_s2 + $0x34] sm:$0xf]  ;;  %v1972_v40 = vld [vmem:[%s2986_s1 + $0x8] sm:$0xff] }
   0xc   :  { %v1980_v41 = vld [vmem:[%s2986_s1 + $0x48] sm:$0xff]  ;;  %v42_v42 = vld [vmem:[%s2989_s0] sm:$0xff]  ;;  %v1488_v43 = vor.u32 %v1994_v37, %v1487_v36  ;;  %v1492_v44 = vor.u32 %v1993_v38, %v1489_v39  ;;  %v1471_v57 = vld [vmem:[%s2987_s2 + $0x10] sm:$0xf] }
   0xd   :  { %v1479_v45 = vld [vmem:[%s2987_s2 + $0x20] sm:$0xf]  ;;  %v1992_v46 = vld [vmem:[%s2987_s2 + $0x24] sm:$0xf0]  ;;  %v1991_v47 = vld [vmem:[%s2987_s2 + $0x24] sm:$0xf]  ;;  %v80_v49 = vunpack.c.l.b16 %v42_v42  ;;  %v81_v50 = vunpack.c.h.b16 %v42_v42 }
   0xe   :  { %185 = vmatpush.bf16.msra.mxu0 %v1975_v16  ;;  %316 = vmatpush.bf16.msra.mxu2 %v1504_v27  ;;  %v1481_v48 = vld [vmem:[%s2987_s2 + $0x28] sm:$0xf0]  ;;  %v1480_v51 = vor.u32 %v1992_v46, %v1479_v45  ;;  %v1971_v53 = vld [vmem:[%s2986_s1] sm:$0xff]  ;;  %v1990_v58 = vld [vmem:[%s2987_s2 + $0x14] sm:$0xf0] }
   0xf   :  { %198 = vmatpush.bf16.msra.mxu1 %v1983_v17  ;;  %329 = vmatpush.bf16.msra.mxu3 %v1508_v28  ;;  %v1484_v52 = vor.u32 %v1991_v47, %v1481_v48  ;;  %v1979_v54 = vld [vmem:[%s2986_s1 + $0x40] sm:$0xff]  ;;  %v82_v55 = vpack.c.b16 %v80_v49, %v80_v49  ;;  %v83_v56 = vpack.c.b16 %v81_v50, %v81_v50  ;;  %v1989_v59 = vld [vmem:[%s2987_s2 + $0x14] sm:$0xf]  ;;  %v1473_v61 = vld [vmem:[%s2987_s2 + $0x18] sm:$0xf0] }
  0x10   :  { %v1472_v60 = vor.u32 %v1990_v58, %v1471_v57  ;;  %v1476_v62 = vor.u32 %v1989_v59, %v1473_v61  ;;  %v1463_v63 = vld [vmem:[%s2987_s2] sm:$0xf]  ;;  %v1988_v0 = vld [vmem:[%s2987_s2 + $0x4] sm:$0xf0]  ;;  %v1987_v1 = vld [vmem:[%s2987_s2 + $0x4] sm:$0xf] }
  0x11   :  { %v1464_v2 = vor.u32 %v1988_v0, %v1463_v63  ;;  %v1465_v3 = vld [vmem:[%s2987_s2 + $0x8] sm:$0xf0]  ;;  %v1583_v5 = vld [vmem:[%s2990_s3 + $0x70] sm:$0xf]  ;;  %v2018_v6 = vld [vmem:[%s2990_s3 + $0x74] sm:$0xf0] }
  0x12   :  { %186 = vmatpush.bf16.msra.mxu0 %v1974_v24  ;;  %317 = vmatpush.bf16.msra.mxu2 %v1496_v34  ;;  %v1468_v4 = vor.u32 %v1987_v1, %v1465_v3  ;;  %v1647_v7 = vld [vmem:[%s2990_s3 + $0xf0] sm:$0xf]  ;;  %v1584_v8 = vor.u32 %v2018_v6, %v1583_v5  ;;  %v2034_v9 = vld [vmem:[%s2990_s3 + $0xf4] sm:$0xf0]  ;;  %v2017_v10 = vld [vmem:[%s2990_s3 + $0x74] sm:$0xf] }
  0x13   :  { %199 = vmatpush.bf16.msra.mxu1 %v1982_v25  ;;  %330 = vmatpush.bf16.msra.mxu3 %v1500_v35  ;;  %v1585_v11 = vld [vmem:[%s2990_s3 + $0x78] sm:$0xf0]  ;;  %v1648_v12 = vor.u32 %v2034_v9, %v1647_v7  ;;  %v2033_v14 = vld [vmem:[%s2990_s3 + $0xf4] sm:$0xf]  ;;  %v1575_v16 = vld [vmem:[%s2990_s3 + $0x60] sm:$0xf] }
  0x14   :  { %v1588_v13 = vor.u32 %v2017_v10, %v1585_v11  ;;  %v1649_v15 = vld [vmem:[%s2990_s3 + $0xf8] sm:$0xf0]  ;;  %v2016_v18 = vld [vmem:[%s2990_s3 + $0x64] sm:$0xf0]  ;;  %v1639_v19 = vld [vmem:[%s2990_s3 + $0xe0] sm:$0xf] }
  0x15   :  { %v1652_v17 = vor.u32 %v2033_v14, %v1649_v15  ;;  %v2032_v20 = vld [vmem:[%s2990_s3 + $0xe4] sm:$0xf0]  ;;  %v1576_v21 = vor.u32 %v2016_v18, %v1575_v16  ;;  %v2015_v23 = vld [vmem:[%s2990_s3 + $0x64] sm:$0xf]  ;;  %v1577_v24 = vld [vmem:[%s2990_s3 + $0x68] sm:$0xf0] }
  0x16   :  { %187 = vmatpush.bf16.msra.mxu0 %v1973_v32  ;;  %318 = vmatpush.bf16.msra.mxu2 %v1488_v43  ;;  %v1640_v22 = vor.u32 %v2032_v20, %v1639_v19  ;;  %v2031_v25 = vld [vmem:[%s2990_s3 + $0xe4] sm:$0xf]  ;;  %v1580_v26 = vor.u32 %v2015_v23, %v1577_v24  ;;  %v1641_v27 = vld [vmem:[%s2990_s3 + $0xe8] sm:$0xf0]  ;;  %v1567_v28 = vld [vmem:[%s2990_s3 + $0x50] sm:$0xf] }
  0x17   :  { %200 = vmatpush.bf16.msra.mxu1 %v1981_v33  ;;  %331 = vmatpush.bf16.msra.mxu3 %v1492_v44  ;;  %v2014_v29 = vld [vmem:[%s2990_s3 + $0x54] sm:$0xf0]  ;;  %v1644_v30 = vor.u32 %v2031_v25, %v1641_v27  ;;  %v1631_v31 = vld [vmem:[%s2990_s3 + $0xd0] sm:$0xf]  ;;  %v2013_v33 = vld [vmem:[%s2990_s3 + $0x54] sm:$0xf] }
  0x18   :  { %v2030_v32 = vld [vmem:[%s2990_s3 + $0xd4] sm:$0xf0]  ;;  %v1568_v34 = vor.u32 %v2014_v29, %v1567_v28  ;;  %v1569_v35 = vld [vmem:[%s2990_s3 + $0x58] sm:$0xf0]  ;;  %v2029_v36 = vld [vmem:[%s2990_s3 + $0xd4] sm:$0xf] }
  0x19   :  { %v1633_v37 = vld [vmem:[%s2990_s3 + $0xd8] sm:$0xf0]  ;;  %v1632_v38 = vor.u32 %v2030_v32, %v1631_v31  ;;  %v1572_v39 = vor.u32 %v2013_v33, %v1569_v35  ;;  %v1623_v42 = vld [vmem:[%s2990_s3 + $0xc0] sm:$0xf]  ;;  %v2028_v44 = vld [vmem:[%s2990_s3 + $0xc4] sm:$0xf0] }
  0x1a   :  { %188 = vmatpush.bf16.msra.mxu0 %v1972_v40  ;;  %319 = vmatpush.bf16.msra.mxu2 %v1480_v51  ;;  %v1559_v40 = vld [vmem:[%s2990_s3 + $0x40] sm:$0xf]  ;;  %v1636_v43 = vor.u32 %v2029_v36, %v1633_v37  ;;  %v2011_v45 = vld [vmem:[%s2990_s3 + $0x44] sm:$0xf]  ;;  %v1561_v46 = vld [vmem:[%s2990_s3 + $0x48] sm:$0xf0]  ;;  %v1624_v50 = vor.u32 %v2028_v44, %v1623_v42 }
  0x1b   :  { %201 = vmatpush.bf16.msra.mxu1 %v1980_v41  ;;  %332 = vmatpush.bf16.msra.mxu3 %v1484_v52  ;;  %v2012_v41 = vld [vmem:[%s2990_s3 + $0x44] sm:$0xf0]  ;;  %v2027_v47 = vld [vmem:[%s2990_s3 + $0xc4] sm:$0xf]  ;;  %v1625_v48 = vld [vmem:[%s2990_s3 + $0xc8] sm:$0xf0]  ;;  %v1564_v51 = vor.u32 %v2011_v45, %v1561_v46 }
  0x1c   :  { %v1560_v49 = vor.u32 %v2012_v41, %v1559_v40  ;;  %v1551_v52 = vld [vmem:[%s2990_s3 + $0x30] sm:$0xf]  ;;  %v2009_v57 = vld [vmem:[%s2990_s3 + $0x34] sm:$0xf]  ;;  %v1553_v58 = vld [vmem:[%s2990_s3 + $0x38] sm:$0xf0] }
  0x1d   :  { %v2025_v59 = vld [vmem:[%s2990_s3 + $0xb4] sm:$0xf]  ;;  %v1556_v63 = vor.u32 %v2009_v57, %v1553_v58  ;;  %v1543_v0 = vld [vmem:[%s2990_s3 + $0x20] sm:$0xf]  ;;  %v2008_v1 = vld [vmem:[%s2990_s3 + $0x24] sm:$0xf0] }
  0x1e   :  { %189 = vmatpush.bf16.msra.mxu0 %v1971_v53  ;;  %320 = vmatpush.bf16.msra.mxu2 %v1472_v60  ;;  %v2010_v53 = vld [vmem:[%s2990_s3 + $0x34] sm:$0xf0]  ;;  %v1617_v60 = vld [vmem:[%s2990_s3 + $0xb8] sm:$0xf0]  ;;  %v2007_v5 = vld [vmem:[%s2990_s3 + $0x24] sm:$0xf]  ;;  %v1544_v10 = vor.u32 %v2008_v1, %v1543_v0 }
  0x1f   :  { %202 = vmatpush.bf16.msra.mxu1 %v1979_v54  ;;  %333 = vmatpush.bf16.msra.mxu3 %v1476_v62  ;;  %v1615_v54 = vld [vmem:[%s2990_s3 + $0xb0] sm:$0xf]  ;;  %v1552_v61 = vor.u32 %v2010_v53, %v1551_v52  ;;  %v1620_v3 = vor.u32 %v2025_v59, %v1617_v60  ;;  %v1545_v6 = vld [vmem:[%s2990_s3 + $0x28] sm:$0xf0]  ;;  %v2023_v7 = vld [vmem:[%s2990_s3 + $0xa4] sm:$0xf] }
  0x20   :  { %v2114_v9 = vld [vmem:[%s2988_s11] ss:$0 sm:$0xff]  ;;  %v1535_v23 = vld [vmem:[%s2990_s3 + $0x10] sm:$0xf]  ;;  %v2006_v24 = vld [vmem:[%s2990_s3 + $0x14] sm:$0xf0] }
  0x21   :  { %190 = vmatmul.bf16.vlgmr.msra.gmra.mxu0 %v82_v55  ;;  %v1628_v55 = vor.u32 %v2027_v47, %v1625_v48  ;;  %v1599_v25 = vld [vmem:[%s2990_s3 + $0x90] sm:$0xf]  ;;  %v2022_v27 = vld [vmem:[%s2990_s3 + $0x94] sm:$0xf0]  ;;  %v2005_v28 = vld [vmem:[%s2990_s3 + $0x14] sm:$0xf] }
  0x22   :  { %203 = vmatmul.bf16.vlgmr.msra.gmra.mxu1 %v83_v56  ;;  %321 = vmatpush.bf16.msra.mxu2 %v1464_v2  ;;  %v2026_v56 = vld [vmem:[%s2990_s3 + $0xb4] sm:$0xf0]  ;;  %v1607_v2 = vld [vmem:[%s2990_s3 + $0xa0] sm:$0xf]  ;;  %v1600_v29 = vor.u32 %v2022_v27, %v1599_v25  ;;  %v2021_v31 = vld [vmem:[%s2990_s3 + $0x94] sm:$0xf] }
  0x23   :  { %334 = vmatpush.bf16.msra.mxu3 %v1468_v4  ;;  %546 = vmatpush.bf16.msrb.mxu0 %v1584_v8  ;;  %v1616_v62 = vor.u32 %v2026_v56, %v1615_v54  ;;  %v2024_v4 = vld [vmem:[%s2990_s3 + $0xa4] sm:$0xf0]  ;;  %v1609_v8 = vld [vmem:[%s2990_s3 + $0xa8] sm:$0xf0]  ;;  %v1601_v32 = vld [vmem:[%s2990_s3 + $0x98] sm:$0xf0] }
  0x24   :  { %559 = vmatpush.bf16.msrb.mxu1 %v1648_v12  ;;  %v1608_v11 = vor.u32 %v2024_v4, %v1607_v2  ;;  %v1548_v12 = vor.u32 %v2007_v5, %v1545_v6  ;;  %v1527_v35 = vld [vmem:[%s2990_s3] sm:$0xf]  ;;  %v2004_v36 = vld [vmem:[%s2990_s3 + $0x4] sm:$0xf0]  ;;  %v2003_v40 = vld [vmem:[%s2990_s3 + $0x4] sm:$0xf] }
  0x25   :  { %v1591_v37 = vld [vmem:[%s2990_s3 + $0x80] sm:$0xf]  ;;  %v1529_v41 = vld [vmem:[%s2990_s3 + $0x8] sm:$0xf0]  ;;  %v2019_v44 = vld [vmem:[%s2990_s3 + $0x84] sm:$0xf] }
  0x26   :  { %572 = vmatpush.bf16.msrb.mxu2 %v1588_v13  ;;  %v1612_v13 = vor.u32 %v2023_v7, %v1609_v8  ;;  %v1593_v45 = vld [vmem:[%s2990_s3 + $0x88] sm:$0xf0]  ;;  %v2042_v47 = vld [vmem:[%s2991_s4 + $0x38] sm:$0xff]  ;;  %v2039_v53 = vld [vmem:[%s2991_s4 + $0x20] sm:$0xff] }
  0x27   :  { %585 = vmatpush.bf16.msrb.mxu3 %v1652_v17  ;;  %547 = vmatpush.bf16.msrb.mxu0 %v1576_v21  ;;  %v1596_v46 = vor.u32 %v2019_v44, %v1593_v45  ;;  %v2050_v48 = vld [vmem:[%s2991_s4 + $0x78] sm:$0xff]  ;;  %v2048_v52 = vld [vmem:[%s2991_s4 + $0x68] sm:$0xff]  ;;  %v2047_v54 = vld [vmem:[%s2991_s4 + $0x60] sm:$0xff] }
  0x28   :  { %560 = vmatpush.bf16.msrb.mxu1 %v1640_v22  ;;  %v2046_v56 = vld [vmem:[%s2991_s4 + $0x58] sm:$0xff]  ;;  %v228_v57 = vld [vmem:[%s2988_s11 + $0x1] sm:$0x3]  ;;  %v2037_v58 = vld [vmem:[%s2991_s4 + $0x10] sm:$0xff] }
  0x29   :  { %v230_v59 = vperm.slane %v228_v57, 0  ;;  %v231_v60 = vperm.slane %v228_v57, 1  ;;  %v2054_v57 = vld [vmem:[%s2993_s6 + $0xc] sm:$0xf] }
  0x2a   :  { %573 = vmatpush.bf16.msrb.mxu2 %v1580_v26  ;;  %v1536_v26 = vor.u32 %v2006_v24, %v1535_v23 }
  0x2b   :  { %586 = vmatpush.bf16.msrb.mxu3 %v1644_v30  ;;  %548 = vmatpush.bf16.msrb.mxu0 %v1568_v34  ;;  %v1537_v30 = vld [vmem:[%s2990_s3 + $0x18] sm:$0xf0]  ;;  %v1604_v34 = vor.u32 %v2021_v31, %v1601_v32  ;;  %v2051_v32 = vld [vmem:[%s2992_s5] sm:$0xff] }
  0x2c   :  { %561 = vmatpush.bf16.msrb.mxu1 %v1632_v38  ;;  %v1540_v33 = vor.u32 %v2005_v28, %v1537_v30  ;;  %v1528_v38 = vor.u32 %v2004_v36, %v1527_v35 }
  0x2e   :  { %574 = vmatpush.bf16.msrb.mxu2 %v1572_v39  ;;  %v2020_v39 = vld [vmem:[%s2990_s3 + $0x84] sm:$0xf0] }
  0x2f   :  { %587 = vmatpush.bf16.msrb.mxu3 %v1636_v43  ;;  %549 = vmatpush.bf16.msrb.mxu0 %v1560_v49  ;;  %v1592_v42 = vor.u32 %v2020_v39, %v1591_v37  ;;  %v1532_v43 = vor.u32 %v2003_v40, %v1529_v41  ;;  %v2041_v49 = vld [vmem:[%s2991_s4 + $0x30] sm:$0xff]  ;;  %v2115_v37 = vld [vmem:[%s2988_s11 + $0x5] ss:$0 sm:$0xff] }
  0x30   :  { %562 = vmatpush.bf16.msrb.mxu1 %v1624_v50  ;;  %v2049_v50 = vld [vmem:[%s2991_s4 + $0x70] sm:$0xff] }
  0x32   :  { %575 = vmatpush.bf16.msrb.mxu2 %v1564_v51  ;;  %v2040_v51 = vld [vmem:[%s2991_s4 + $0x28] sm:$0xff] }
  0x33   :  { %588 = vmatpush.bf16.msrb.mxu3 %v1628_v55  ;;  %550 = vmatpush.bf16.msrb.mxu0 %v1552_v61  ;;  %v2038_v55 = vld [vmem:[%s2991_s4 + $0x18] sm:$0xff] }
  0x34   :  { %563 = vmatpush.bf16.msrb.mxu1 %v1616_v62 }
  0x36   :  { %576 = vmatpush.bf16.msrb.mxu2 %v1556_v63 }
  0x37   :  { %589 = vmatpush.bf16.msrb.mxu3 %v1620_v3  ;;  %551 = vmatpush.bf16.msrb.mxu0 %v1544_v10  ;;  %v2045_v10 = vld [vmem:[%s2991_s4 + $0x50] sm:$0xff] }
  0x38   :  { %564 = vmatpush.bf16.msrb.mxu1 %v1608_v11  ;;  %v2035_v11 = vld [vmem:[%s2991_s4] sm:$0xff] }
  0x3a   :  { %577 = vmatpush.bf16.msrb.mxu2 %v1548_v12  ;;  %v2044_v12 = vld [vmem:[%s2991_s4 + $0x48] sm:$0xff] }
  0x3b   :  { %590 = vmatpush.bf16.msrb.mxu3 %v1612_v13  ;;  %552 = vmatpush.bf16.msrb.mxu0 %v1536_v26  ;;  %v2043_v13 = vld [vmem:[%s2991_s4 + $0x40] sm:$0xff] }
  0x3c   :  { %565 = vmatpush.bf16.msrb.mxu1 %v1600_v29 }
  0x3e   :  { %578 = vmatpush.bf16.msrb.mxu2 %v1540_v33  ;;  %v1744_v33 = vld [vmem:[%s2993_s6 + $0x20] sm:$0xf] }
  0x3f   :  { %591 = vmatpush.bf16.msrb.mxu3 %v1604_v34  ;;  %553 = vmatpush.bf16.msrb.mxu0 %v1528_v38  ;;  %v2059_v34 = vld [vmem:[%s2993_s6 + $0x2c] sm:$0xf0] }
  0x40   :  { %566 = vmatpush.bf16.msrb.mxu1 %v1592_v42  ;;  %v1745_v35 = vor.u32 %v2059_v34, %v1744_v33  ;;  %v2075_v34 = vld [vmem:[%s2994_s7 + $0x74] sm:$0xf] }
  0x42   :  { %579 = vmatpush.bf16.msrb.mxu2 %v1532_v43 }
  0x43   :  { %592 = vmatpush.bf16.msrb.mxu3 %v1596_v46  ;;  %732 = vmatpush.bf16.msra.mxu0 %v2042_v47  ;;  %v2057_v46 = vld [vmem:[%s2993_s6 + $0x24] sm:$0xf]  ;;  %v1746_v47 = vld [vmem:[%s2993_s6 + $0x30] sm:$0xf0] }
  0x44   :  { %745 = vmatpush.bf16.msra.mxu1 %v2050_v48  ;;  %v2058_v48 = vld [vmem:[%s2993_s6 + $0x2c] sm:$0xf] }
  0x47   :  { %733 = vmatpush.bf16.msra.mxu0 %v2041_v49  ;;  %v1749_v49 = vor.u32 %v2057_v46, %v1746_v47 }
  0x48   :  { %746 = vmatpush.bf16.msra.mxu1 %v2049_v50  ;;  %v1754_v50 = vld [vmem:[%s2993_s6 + $0x38] sm:$0xf0] }
  0x4b   :  { %734 = vmatpush.bf16.msra.mxu0 %v2040_v51  ;;  %v1757_v51 = vor.u32 %v2058_v48, %v1754_v50  ;;  %v2073_v48 = vld [vmem:[%s2994_s7 + $0x64] sm:$0xf] }
  0x4c   :  { %747 = vmatpush.bf16.msra.mxu1 %v2048_v52  ;;  %v1728_v52 = vld [vmem:[%s2993_s6] sm:$0xf] }
  0x4f   :  { %735 = vmatpush.bf16.msra.mxu0 %v2039_v53  ;;  %v2055_v53 = vld [vmem:[%s2993_s6 + $0xc] sm:$0xf0] }
  0x50   :  { %748 = vmatpush.bf16.msra.mxu1 %v2047_v54  ;;  %v2053_v54 = vld [vmem:[%s2993_s6 + $0x4] sm:$0xf] }
  0x53   :  { %736 = vmatpush.bf16.msra.mxu0 %v2038_v55  ;;  %v1729_v55 = vor.u32 %v2055_v53, %v1728_v52  ;;  %v1852_v52 = vld [vmem:[%s2994_s7 + $0xb0] sm:$0xf] }
  0x54   :  { %749 = vmatpush.bf16.msra.mxu1 %v2046_v56  ;;  %v1730_v56 = vld [vmem:[%s2993_s6 + $0x10] sm:$0xf0] }
  0x57   :  { %737 = vmatpush.bf16.msra.mxu0 %v2037_v58  ;;  %v1738_v58 = vld [vmem:[%s2993_s6 + $0x18] sm:$0xf0] }
  0x58   :  { %750 = vmatpush.bf16.msra.mxu1 %v2045_v10  ;;  %v1886_v10 = vld [vmem:[%s2994_s7 + $0xf8] sm:$0xf0] }
  0x5c   :  { %751 = vmatpush.bf16.msra.mxu1 %v2044_v12 }
  0x60   :  { %752 = vmatpush.bf16.msra.mxu1 %v2043_v13  ;;  %v2074_v13 = vld [vmem:[%s2994_s7 + $0x64] sm:$0xf0] }
  0x9e   :  { %v191_v14 = vpop.f32.mrf.mxu0 }
  0x9f   :  { %v204_v15 = vpop.f32.mrf.mxu1  ;;  %v192_v16 = vadd.f32 %v2114_v9, %v191_v14  ;;  %v2036_v9 = vld [vmem:[%s2991_s4 + $0x8] sm:$0xff] }
  0xa0   :  { %738 = vmatpush.bf16.msra.mxu0 %v2036_v9  ;;  %v2052_v14 = vld [vmem:[%s2992_s5 + $0x8] sm:$0xff]  ;;  %v2091_v9 = vld [vmem:[%s2994_s7 + $0xf4] sm:$0xf] }
  0xa1   :  { %v205_v17 = vadd.f32 %v204_v15, %v192_v16  ;;  %v380_v15 = vld [vmem:[%s2988_s11 + $0x3] sm:$0x3]  ;;  %v1889_v12 = vor.u32 %v2091_v9, %v1886_v10  ;;  %v2082_v10 = vld [vmem:[%s2994_s7 + $0xa4] sm:$0xf0] }
  0xa2   :  { %v382_v16 = vperm.slane %v380_v15, 0 }
  0xa3   :  { %v209_v18 = vmul.f32 0.01, %v205_v17  ;;  %vm208_vm0 = vcmp.gt.f32.partialorder %v205_v17, 0.0 }
  0xa4   :  { %739 = vmatpush.bf16.msra.mxu0 %v2035_v11  ;;  %v1812_v11 = vld [vmem:[%s2994_s7 + $0x60] sm:$0xf] }
  0xa5   :  { %v210_v19 = vsel %vm208_vm0, %v205_v17, %v209_v18 }
  0xa6   :  { %v193_v20 = vpop.f32.mrf.mxu0  ;;  %v211_v22 = vpack.c.bf16 %v210_v19, %v210_v19 }
  0xa7   :  { %v206_v21 = vpop.f32.mrf.mxu1 }
  0xa8   :  { %322 = vmatmul.bf16.vlgmr.msra.gmra.mxu2 %v211_v22  ;;  %335 = vmatmul.bf16.vlgmr.msra.gmra.mxu3 %v211_v22  ;;  %v383_v21 = vperm.slane %v380_v15, 1  ;;  %v2090_v15 = vld [vmem:[%s2994_s7 + $0xe4] sm:$0xf0] }
  0xa9   :  { %792 = vmatpush.bf16.msra.mxu2 %v2052_v14  ;;  %870 = vmatpush.bf16.msra.mxu3 %v1745_v35  ;;  %v1876_v14 = vld [vmem:[%s2994_s7 + $0xe0] sm:$0xf]  ;;  %v1822_v35 = vld [vmem:[%s2994_s7 + $0x78] sm:$0xf0] }
  0xaa   :  { %v1825_v46 = vor.u32 %v2075_v34, %v1822_v35  ;;  %v2078_v34 = vld [vmem:[%s2994_s7 + $0x84] sm:$0xf0]  ;;  %v2061_v35 = vld [vmem:[%s2994_s7 + $0x4] sm:$0xf] }
  0xad   :  { %793 = vmatpush.bf16.msra.mxu2 %v2051_v32  ;;  %871 = vmatpush.bf16.msra.mxu3 %v1729_v55  ;;  %v2070_v32 = vld [vmem:[%s2994_s7 + $0x44] sm:$0xf0]  ;;  %v2083_v55 = vld [vmem:[%s2994_s7 + $0xb4] sm:$0xf] }
 0x12b   :  { %v323_v61 = vpop.f32.mrf.mxu2  ;;  %v336_v62 = vpop.f32.mrf.mxu3 }
 0x12c   :  { %v324_v63 = vadd.f32 %v323_v61, %v230_v59  ;;  %v337_v0 = vadd.f32 %v336_v62, %v231_v60  ;;  %v1733_v59 = vor.u32 %v2053_v54, %v1730_v56  ;;  %v1741_v60 = vor.u32 %v2054_v57, %v1738_v58  ;;  %v1752_v61 = vld [vmem:[%s2993_s6 + $0x28] sm:$0xf]  ;;  %v2060_v62 = vld [vmem:[%s2993_s6 + $0x34] sm:$0xf0]  ;;  %v1854_v56 = vld [vmem:[%s2994_s7 + $0xb8] sm:$0xf0] }
 0x12d   :  { %v2084_v54 = vld [vmem:[%s2994_s7 + $0xb4] sm:$0xf0] }
 0x12e   :  { %vm340_vm1 = vcmp.gt.f32.partialorder %v324_v63, 0.0  ;;  %v342_v1 = vmul.f32 0.01, %v324_v63  ;;  %vm341_vm2 = vcmp.gt.f32.partialorder %v337_v0, 0.0  ;;  %v343_v2 = vmul.f32 0.01, %v337_v0 }
 0x130   :  { %v344_v3 = vsel %vm340_vm1, %v324_v63, %v342_v1  ;;  %v345_v4 = vsel %vm341_vm2, %v337_v0, %v343_v2  ;;  %v1753_v63 = vor.u32 %v2060_v62, %v1752_v61  ;;  %v1736_v0 = vld [vmem:[%s2993_s6 + $0x8] sm:$0xf]  ;;  %v2056_v1 = vld [vmem:[%s2993_s6 + $0x14] sm:$0xf0]  ;;  %v1853_v61 = vor.u32 %v2084_v54, %v1852_v52 }
 0x131   :  { %v346_v5 = vpack.c.bf16 %v344_v3, %v344_v3  ;;  %v347_v6 = vpack.c.bf16 %v345_v4, %v345_v4  ;;  %v1737_v2 = vor.u32 %v2056_v1, %v1736_v0  ;;  %v1820_v3 = vld [vmem:[%s2994_s7 + $0x70] sm:$0xf]  ;;  %v2076_v4 = vld [vmem:[%s2994_s7 + $0x74] sm:$0xf0]  ;;  %v1857_v62 = vor.u32 %v2083_v55, %v1854_v56  ;;  %v2069_v0 = vld [vmem:[%s2994_s7 + $0x44] sm:$0xf] }
 0x132   :  { %v1798_v1 = vld [vmem:[%s2994_s7 + $0x48] sm:$0xf0] }
 0x133   :  { %v325_v7 = vpop.f32.mrf.mxu2  ;;  %v338_v8 = vpop.f32.mrf.mxu3  ;;  %554 = vmatmul.bf16.vlgmr.msrb.gmra.mxu0 %v346_v5  ;;  %567 = vmatmul.bf16.vlgmr.msrb.gmra.mxu1 %v347_v6 }
 0x134   :  { %580 = vmatmul.bf16.vlgmr.msrb.gmra.mxu2 %v346_v5  ;;  %593 = vmatmul.bf16.vlgmr.msrb.gmra.mxu3 %v347_v6  ;;  %v1884_v5 = vld [vmem:[%s2994_s7 + $0xf0] sm:$0xf]  ;;  %v1821_v6 = vor.u32 %v2076_v4, %v1820_v3  ;;  %v2092_v7 = vld [vmem:[%s2994_s7 + $0xf4] sm:$0xf0]  ;;  %v2067_v3 = vld [vmem:[%s2994_s7 + $0x34] sm:$0xf] }
 0x135   :  { %883 = vmatpush.bf16.msrb.mxu2 %v1749_v49  ;;  %909 = vmatpush.bf16.msrb.mxu0 %v1757_v51  ;;  %v1885_v8 = vor.u32 %v2092_v7, %v1884_v5  ;;  %v1814_v49 = vld [vmem:[%s2994_s7 + $0x68] sm:$0xf0]  ;;  %v1790_v4 = vld [vmem:[%s2994_s7 + $0x38] sm:$0xf0]  ;;  %v2066_v7 = vld [vmem:[%s2994_s7 + $0x24] sm:$0xf0] }
 0x136   :  { %896 = vmatpush.bf16.msrb.mxu3 %v1753_v63  ;;  %1128 = vmatpush.bf16.msrb.mxu1 %v1821_v6  ;;  %v1817_v58 = vor.u32 %v2073_v48, %v1814_v49  ;;  %v1793_v5 = vor.u32 %v2067_v3, %v1790_v4  ;;  %v1780_v6 = vld [vmem:[%s2994_s7 + $0x20] sm:$0xf] }
 0x137   :  { %v1781_v9 = vor.u32 %v2066_v7, %v1780_v6 }
 0x139   :  { %884 = vmatpush.bf16.msrb.mxu2 %v1733_v59  ;;  %910 = vmatpush.bf16.msrb.mxu0 %v1741_v60  ;;  %v2071_v59 = vld [vmem:[%s2994_s7 + $0x54] sm:$0xf]  ;;  %v1806_v60 = vld [vmem:[%s2994_s7 + $0x58] sm:$0xf0] }
 0x13a   :  { %897 = vmatpush.bf16.msrb.mxu3 %v1737_v2  ;;  %v1809_v63 = vor.u32 %v2071_v59, %v1806_v60  ;;  %v1801_v2 = vor.u32 %v2069_v0, %v1798_v1 }
 0x1b0   :  { %v555_v17 = vpop.f32.mrf.mxu0  ;;  %v568_v18 = vpop.f32.mrf.mxu1 }
 0x1b1   :  { %v556_v19 = vadd.f32 %v555_v17, %v382_v16  ;;  %v2116_v16 = vld [vmem:[%s2988_s11 + $0x6] ss:$0 sm:$0xff]  ;;  %v1813_v17 = vor.u32 %v2074_v13, %v1812_v11 }
 0x1b2   :  { %v2065_v11 = vld [vmem:[%s2994_s7 + $0x24] sm:$0xf] }
 0x1b3   :  { %v569_v20 = vadd.f32 %v568_v18, %v556_v19  ;;  %v1877_v18 = vor.u32 %v2090_v15, %v1876_v14  ;;  %v2089_v19 = vld [vmem:[%s2994_s7 + $0xe4] sm:$0xf]  ;;  %1129 = vmatpush.bf16.msrb.mxu1 %v1813_v17 }
 0x1b4   :  { %v2081_v15 = vld [vmem:[%s2994_s7 + $0xa4] sm:$0xf] }
 0x1b5   :  { %v598_v22 = vpack.c.bf16 %v569_v20, %v569_v20  ;;  %v1878_v20 = vld [vmem:[%s2994_s7 + $0xe8] sm:$0xf0] }
 0x1b7   :  { %v581_v23 = vpop.f32.mrf.mxu2  ;;  %v594_v24 = vpop.f32.mrf.mxu3  ;;  %740 = vmatmul.bf16.vlgmr.msra.gmra.mxu0 %v598_v22  ;;  %v2072_v22 = vld [vmem:[%s2994_s7 + $0x54] sm:$0xf0] }
 0x1b8   :  { %v582_v25 = vadd.f32 %v581_v23, %v383_v21  ;;  %v557_v26 = vpop.f32.mrf.mxu0  ;;  %v570_v27 = vpop.f32.mrf.mxu1  ;;  %1167 = vmatpush.bf16.msra.mxu0 %v1889_v12  ;;  %v1804_v21 = vld [vmem:[%s2994_s7 + $0x50] sm:$0xf]  ;;  %v1881_v23 = vor.u32 %v2089_v19, %v1878_v20  ;;  %v1782_v12 = vld [vmem:[%s2994_s7 + $0x28] sm:$0xf0]  ;;  %v2064_v19 = vld [vmem:[%s2994_s7 + $0x14] sm:$0xf0] }
 0x1b9   :  { %v1805_v26 = vor.u32 %v2072_v22, %v1804_v21  ;;  %v2087_v27 = vld [vmem:[%s2994_s7 + $0xd4] sm:$0xf]  ;;  %v1785_v14 = vor.u32 %v2065_v11, %v1782_v12  ;;  %v1836_v20 = vld [vmem:[%s2994_s7 + $0x90] sm:$0xf]  ;;  %v2080_v22 = vld [vmem:[%s2994_s7 + $0x94] sm:$0xf0] }
 0x1ba   :  { %v595_v28 = vadd.f32 %v594_v24, %v582_v25  ;;  %v1868_v24 = vld [vmem:[%s2994_s7 + $0xd0] sm:$0xf]  ;;  %v2088_v25 = vld [vmem:[%s2994_s7 + $0xd4] sm:$0xf0] }
 0x1bb   :  { %1130 = vmatpush.bf16.msrb.mxu1 %v1805_v26  ;;  %v2079_v26 = vld [vmem:[%s2994_s7 + $0x94] sm:$0xf] }
 0x1bc   :  { %v599_v29 = vpack.c.bf16 %v595_v28, %v595_v28  ;;  %v1870_v28 = vld [vmem:[%s2994_s7 + $0xd8] sm:$0xf0]  ;;  %1168 = vmatpush.bf16.msra.mxu0 %v1881_v23  ;;  %v2063_v23 = vld [vmem:[%s2994_s7 + $0x14] sm:$0xf] }
 0x1be   :  { %753 = vmatmul.bf16.vlgmr.msra.gmra.mxu1 %v599_v29 }
 0x1bf   :  { %v583_v30 = vpop.f32.mrf.mxu2  ;;  %v596_v31 = vpop.f32.mrf.mxu3 }
 0x1c0   :  { %v1869_v30 = vor.u32 %v2088_v25, %v1868_v24  ;;  %v1796_v31 = vld [vmem:[%s2994_s7 + $0x40] sm:$0xf]  ;;  %v1837_v24 = vor.u32 %v2080_v22, %v1836_v20  ;;  %v1774_v25 = vld [vmem:[%s2994_s7 + $0x18] sm:$0xf0]  ;;  %v2110_v20 = vld [vmem:[%s2997_s9 + $0x64] sm:$0xf0] }
 0x1c1   :  { %v2109_v22 = vld [vmem:[%s2997_s9 + $0x64] sm:$0xf] }
 0x234   :  { %v741_v36 = vpop.f32.mrf.mxu0 }
 0x235   :  { %v742_v38 = vadd.f32 %v2115_v37, %v741_v36  ;;  %v1873_v36 = vor.u32 %v2087_v27, %v1870_v28  ;;  %v1860_v37 = vld [vmem:[%s2994_s7 + $0xc0] sm:$0xf]  ;;  %v1838_v27 = vld [vmem:[%s2994_s7 + $0x98] sm:$0xf0]  ;;  %v1777_v28 = vor.u32 %v2063_v23, %v1774_v25  ;;  %v1959_v23 = vld [vmem:[%s2997_s9 + $0x68] sm:$0xf0] }
 0x236   :  { %v1962_v25 = vor.u32 %v2109_v22, %v1959_v23 }
 0x237   :  { %1169 = vmatpush.bf16.msra.mxu0 %v1873_v36  ;;  %v1766_v36 = vld [vmem:[%s2994_s7 + $0x8] sm:$0xf0] }
 0x23b   :  { %v754_v39 = vpop.f32.mrf.mxu1 }
 0x23c   :  { %v755_v40 = vadd.f32 %v754_v39, %v742_v38  ;;  %v743_v41 = vpop.f32.mrf.mxu0  ;;  %v2086_v38 = vld [vmem:[%s2994_s7 + $0xc4] sm:$0xf0]  ;;  %v2085_v39 = vld [vmem:[%s2994_s7 + $0xc4] sm:$0xf] }
 0x23d   :  { %v1797_v41 = vor.u32 %v2070_v32, %v1796_v31  ;;  %v1861_v50 = vor.u32 %v2086_v38, %v1860_v37  ;;  %v2062_v31 = vld [vmem:[%s2994_s7 + $0x4] sm:$0xf0]  ;;  %v1828_v32 = vld [vmem:[%s2994_s7 + $0x80] sm:$0xf]  ;;  %v1769_v38 = vor.u32 %v2061_v35, %v1766_v36  ;;  %v1943_v35 = vld [vmem:[%s2997_s9 + $0x48] sm:$0xf0] }
 0x23e   :  { %vm758_vm3 = vcmp.gt.f32.partialorder %v755_v40, 0.0  ;;  %v759_v42 = vmul.f32 0.01, %v755_v40  ;;  %v1829_v37 = vor.u32 %v2078_v34, %v1828_v32  ;;  %v2106_v32 = vld [vmem:[%s2997_s9 + $0x44] sm:$0xf0] }
 0x23f   :  { %1131 = vmatpush.bf16.msrb.mxu1 %v1797_v41  ;;  %v2105_v34 = vld [vmem:[%s2997_s9 + $0x44] sm:$0xf] }
 0x240   :  { %v760_v43 = vsel %vm758_vm3, %v755_v40, %v759_v42  ;;  %v1862_v42 = vld [vmem:[%s2994_s7 + $0xc8] sm:$0xf0] }
 0x241   :  { %v761_v44 = vpack.c.bf16 %v760_v43, %v760_v43  ;;  %v1788_v43 = vld [vmem:[%s2994_s7 + $0x30] sm:$0xf]  ;;  %v1865_v51 = vor.u32 %v2085_v39, %v1862_v42  ;;  %v2077_v39 = vld [vmem:[%s2994_s7 + $0x84] sm:$0xf]  ;;  %v2096_v42 = vld [vmem:[%s2996_s8 + $0x18] sm:$0xff] }
 0x243   :  { %v756_v45 = vpop.f32.mrf.mxu1  ;;  %1725 = vmatmul.msk.bf16.vlgmr.msra.gmra.mxu2 %vm782_vm4, %v761_v44  ;;  %v2068_v44 = vld [vmem:[%s2994_s7 + $0x34] sm:$0xf0]  ;;  %1170 = vmatpush.bf16.msra.mxu0 %v1865_v51 }
 0x244   :  { %1141 = vmatpush.bf16.msra.mxu2 %v1885_v8  ;;  %v1789_v53 = vor.u32 %v2068_v44, %v1788_v43  ;;  %v1844_v8 = vld [vmem:[%s2994_s7 + $0xa0] sm:$0xf]  ;;  %v2095_v43 = vld [vmem:[%s2996_s8 + $0x10] sm:$0xff]  ;;  %v2094_v44 = vld [vmem:[%s2996_s8 + $0x8] sm:$0xff] }
 0x245   :  { %v1845_v13 = vor.u32 %v2082_v10, %v1844_v8 }
 0x246   :  { %1132 = vmatpush.bf16.msrb.mxu1 %v1789_v53  ;;  %v2117_v53 = vld [vmem:[%s2995_s10] ss:$0 sm:$0xff] }
 0x247   :  { %1171 = vmatpush.bf16.msra.mxu0 %v1857_v62 }
 0x248   :  { %1142 = vmatpush.bf16.msra.mxu2 %v1877_v18  ;;  %v1772_v18 = vld [vmem:[%s2994_s7 + $0x10] sm:$0xf] }
 0x249   :  { %v1773_v21 = vor.u32 %v2064_v19, %v1772_v18  ;;  %v1967_v18 = vld [vmem:[%s2997_s9 + $0x78] sm:$0xf0]  ;;  %v1957_v19 = vld [vmem:[%s2997_s9 + $0x60] sm:$0xf] }
 0x24a   :  { %1133 = vmatpush.bf16.msrb.mxu1 %v1781_v9 }
 0x24c   :  { %1143 = vmatpush.bf16.msra.mxu2 %v1869_v30  ;;  %v1764_v30 = vld [vmem:[%s2994_s7] sm:$0xf] }
 0x24e   :  { %1134 = vmatpush.bf16.msrb.mxu1 %v1773_v21 }
 0x250   :  { %1144 = vmatpush.bf16.msra.mxu2 %v1861_v50 }
 0x254   :  { %1145 = vmatpush.bf16.msra.mxu2 %v1853_v61 }
 0x258   :  { %1146 = vmatpush.bf16.msra.mxu2 %v1845_v13 }
 0x25c   :  { %1147 = vmatpush.bf16.msra.mxu2 %v1837_v24  ;;  %v1958_v24 = vor.u32 %v2110_v20, %v1957_v19 }
 0x260   :  { %1148 = vmatpush.bf16.msra.mxu2 %v1829_v37  ;;  %v1946_v37 = vor.u32 %v2105_v34, %v1943_v35 }
 0x2c6   :  { %v795_v29 = vpop.f32.mrf.mxu2 }
 0x2c7   :  { %v796_v33 = vadd.f32 %v2116_v16, %v795_v29  ;;  %v1846_v16 = vld [vmem:[%s2994_s7 + $0xa8] sm:$0xf0]  ;;  %v1841_v29 = vor.u32 %v2079_v26, %v1838_v27  ;;  %v1949_v26 = vld [vmem:[%s2997_s9 + $0x50] sm:$0xf]  ;;  %v2108_v27 = vld [vmem:[%s2997_s9 + $0x54] sm:$0xf0] }
 0x2c8   :  { %v1849_v17 = vor.u32 %v2081_v15, %v1846_v16  ;;  %v2112_v15 = vld [vmem:[%s2997_s9 + $0x74] sm:$0xf0]  ;;  %v2111_v16 = vld [vmem:[%s2997_s9 + $0x74] sm:$0xf] }
 0x2c9   :  { %vm799_vm5 = vcmp.gt.f32.partialorder %v796_v33, 0.0  ;;  %v800_v40 = vmul.f32 0.01, %v796_v33  ;;  %v1970_v21 = vor.u32 %v2111_v16, %v1967_v18  ;;  %v2119_v16 = vld [vmem:[%s2988_s11 + $0xd] ss:$0 sm:$0xff] }
 0x2ca   :  { %1172 = vmatpush.bf16.msra.mxu0 %v1849_v17 }
 0x2cb   :  { %v2727_v45 = vsel %vm799_vm5, %v796_v33, %v800_v40  ;;  %v1765_v33 = vor.u32 %v2062_v31, %v1764_v30  ;;  %v1830_v40 = vld [vmem:[%s2994_s7 + $0x88] sm:$0xf0]  ;;  %v1951_v30 = vld [vmem:[%s2997_s9 + $0x58] sm:$0xf0]  ;;  %v1941_v31 = vld [vmem:[%s2997_s9 + $0x40] sm:$0xf] }
 0x2cc   :  { %v802_v47 = vpack.c.bf16 %v2727_v45, %v2727_v45  ;;  %v1833_v41 = vor.u32 %v2077_v39, %v1830_v40  ;;  %v1942_v36 = vor.u32 %v2106_v32, %v1941_v31  ;;  %v2104_v39 = vld [vmem:[%s2997_s9 + $0x34] sm:$0xf0]  ;;  %v2103_v40 = vld [vmem:[%s2997_s9 + $0x34] sm:$0xf] }
 0x2cd   :  { %1135 = vmatpush.bf16.msrb.mxu1 %v1765_v33 }
 0x2ce   :  { %v797_v57 = vpop.f32.mrf.mxu2  ;;  %1758 = vmatmul.msk.bf16.vlgmr.msra.gmra.mxu3 %vm782_vm4, %v802_v47  ;;  %1759 = vmatmul.msk.bf16.vlgmr.msrb.gmra.mxu2 %vm782_vm4, %v802_v47 }
 0x2cf   :  { %1761 = vmatmul.msk.bf16.vlgmr.msrb.gmra.mxu0 %vm782_vm4, %v802_v47  ;;  %1154 = vmatpush.bf16.msra.mxu3 %v1825_v46  ;;  %v811_v46 = vld [vmem:[%s2988_s11 + $0x7] sm:$0xf] }
 0x2d0   :  { %1173 = vmatpush.bf16.msra.mxu0 %v1841_v29  ;;  %v816_v48 = vperm.slane %v811_v46, 3  ;;  %v813_v51 = vperm.slane %v811_v46, 0  ;;  %v814_v52 = vperm.slane %v811_v46, 1  ;;  %v815_v7 = vperm.slane %v811_v46, 2  ;;  %v2102_v46 = vld [vmem:[%s2997_s9 + $0x24] sm:$0xf0] }
 0x2d1   :  { %1225 = vmatpush.bf16.msra.mxu1 %v2096_v42  ;;  %v1950_v29 = vor.u32 %v2108_v27, %v1949_v26  ;;  %v1935_v42 = vld [vmem:[%s2997_s9 + $0x38] sm:$0xf0] }
 0x2d3   :  { %1155 = vmatpush.bf16.msra.mxu3 %v1817_v58 }
 0x2d4   :  { %1174 = vmatpush.bf16.msra.mxu0 %v1833_v41 }
 0x2d5   :  { %1226 = vmatpush.bf16.msra.mxu1 %v2095_v43  ;;  %v1938_v43 = vor.u32 %v2103_v40, %v1935_v42 }
 0x2d7   :  { %1156 = vmatpush.bf16.msra.mxu3 %v1809_v63 }
 0x2d9   :  { %1227 = vmatpush.bf16.msra.mxu1 %v2094_v44  ;;  %v1925_v44 = vld [vmem:[%s2997_s9 + $0x20] sm:$0xf] }
 0x2db   :  { %1157 = vmatpush.bf16.msra.mxu3 %v1801_v2 }
 0x2de   :  { %1760 = vmatmul.msk.bf16.vlgmr.msrb.gmra.mxu3 %vm782_vm4, %v802_v47  ;;  %v2093_v47 = vld [vmem:[%s2996_s8] sm:$0xff] }
 0x2df   :  { %1158 = vmatpush.bf16.msra.mxu3 %v1793_v5  ;;  %1228 = vmatpush.bf16.msra.mxu1 %v2093_v47  ;;  %v2101_v47 = vld [vmem:[%s2997_s9 + $0x24] sm:$0xf] }
 0x2e3   :  { %1159 = vmatpush.bf16.msra.mxu3 %v1785_v14  ;;  %v1965_v14 = vld [vmem:[%s2997_s9 + $0x70] sm:$0xf] }
 0x2e4   :  { %v1966_v17 = vor.u32 %v2112_v15, %v1965_v14 }
 0x2e6   :  { %1340 = vmatpush.bf16.msrb.mxu2 %v1966_v17 }
 0x2e7   :  { %1160 = vmatpush.bf16.msra.mxu3 %v1777_v28  ;;  %v2107_v28 = vld [vmem:[%s2997_s9 + $0x54] sm:$0xf] }
 0x2e8   :  { %v1954_v33 = vor.u32 %v2107_v28, %v1951_v30  ;;  %v1254_v28 = vld [vmem:[%s2988_s11 + $0xe] sm:$0x3] }
 0x2e9   :  { %v1257_v30 = vperm.slane %v1254_v28, 1 }
 0x2ea   :  { %1341 = vmatpush.bf16.msrb.mxu2 %v1958_v24 }
 0x2eb   :  { %1161 = vmatpush.bf16.msra.mxu3 %v1769_v38  ;;  %v1933_v38 = vld [vmem:[%s2997_s9 + $0x30] sm:$0xf] }
 0x2ec   :  { %v1934_v41 = vor.u32 %v2104_v39, %v1933_v38 }
 0x2ee   :  { %1342 = vmatpush.bf16.msrb.mxu2 %v1950_v29  ;;  %v1256_v29 = vperm.slane %v1254_v28, 0 }
 0x2ef   :  { %1353 = vmatpush.bf16.msrb.mxu3 %v1970_v21 }
 0x2f2   :  { %1343 = vmatpush.bf16.msrb.mxu2 %v1942_v36 }
 0x2f3   :  { %1354 = vmatpush.bf16.msrb.mxu3 %v1962_v25 }
 0x2f6   :  { %1344 = vmatpush.bf16.msrb.mxu2 %v1934_v41 }
 0x2f7   :  { %1355 = vmatpush.bf16.msrb.mxu3 %v1954_v33 }
 0x2fb   :  { %1356 = vmatpush.bf16.msrb.mxu3 %v1946_v37 }
 0x2ff   :  { %1357 = vmatpush.bf16.msrb.mxu3 %v1938_v43 }
 0x34c   :  { %v912_v49 = vpop.f32.mrf.mxu0 }
 0x34d   :  { %v913_v50 = vadd.f32 %v912_v49, %v816_v48  ;;  %v1926_v48 = vor.u32 %v2102_v46, %v1925_v44  ;;  %v1927_v49 = vld [vmem:[%s2997_s9 + $0x28] sm:$0xf0] }
 0x34f   :  { %v926_v54 = vmul.f32 0.01, %v913_v50  ;;  %vm925_vm6 = vcmp.gt.f32.partialorder %v913_v50, 0.0  ;;  %1345 = vmatpush.bf16.msrb.mxu2 %v1926_v48 }
 0x351   :  { %v873_v55 = vpop.f32.mrf.mxu3  ;;  %v886_v56 = vpop.f32.mrf.mxu2  ;;  %v927_v57 = vsel %vm925_vm6, %v913_v50, %v926_v54  ;;  %v1930_v50 = vor.u32 %v2101_v47, %v1927_v49  ;;  %v2099_v54 = vld [vmem:[%s2997_s9 + $0x14] sm:$0xf] }
 0x352   :  { %v874_v58 = vadd.f32 %v873_v55, %v813_v51  ;;  %v887_v59 = vadd.f32 %v886_v56, %v814_v52  ;;  %v1370_v60 = vmul.f32 %v2117_v53, %v927_v57  ;;  %v2118_v51 = vld [vmem:[%s2988_s11 + $0x10] ss:$0 sm:$0xff]  ;;  %v2100_v53 = vld [vmem:[%s2997_s9 + $0x14] sm:$0xf0]  ;;  %v1919_v56 = vld [vmem:[%s2997_s9 + $0x18] sm:$0xf0] }
 0x353   :  { %1358 = vmatpush.bf16.msrb.mxu3 %v1930_v50  ;;  %v1917_v52 = vld [vmem:[%s2997_s9 + $0x10] sm:$0xf]  ;;  %v1922_v57 = vor.u32 %v2099_v54, %v1919_v56 }
 0x354   :  { %vm916_vm8 = vcmp.gt.f32.partialorder %v874_v58, 0.0  ;;  %v918_v61 = vmul.f32 0.01, %v874_v58  ;;  %vm917_vm9 = vcmp.gt.f32.partialorder %v887_v59, 0.0  ;;  %v919_v62 = vmul.f32 0.01, %v887_v59  ;;  %v914_v63 = vpop.f32.mrf.mxu0 }
 0x355   :  { %v1372_v0 = vsel %vm1371_vm7, %v1370_v60, 0.0  ;;  %v1918_v55 = vor.u32 %v2100_v53, %v1917_v52  ;;  %v1909_v60 = vld [vmem:[%s2997_s9] sm:$0xf] }
 0x356   :  { %v920_v1 = vsel %vm916_vm8, %v874_v58, %v918_v61  ;;  %v921_v2 = vsel %vm917_vm9, %v887_v59, %v919_v62  ;;  %1373 = vadd.xlane.f32.xlu0 %v1372_v0  ;;  %v2098_v61 = vld [vmem:[%s2997_s9 + $0x4] sm:$0xf0]  ;;  %v2097_v62 = vld [vmem:[%s2997_s9 + $0x4] sm:$0xf]  ;;  %v1911_v0 = vld [vmem:[%s2997_s9 + $0x8] sm:$0xf0] }
 0x357   :  { %v928_v3 = vpack.c.bf16 %v920_v1, %v920_v1  ;;  %v929_v4 = vpack.c.bf16 %v921_v2, %v921_v2  ;;  %1346 = vmatpush.bf16.msrb.mxu2 %v1918_v55  ;;  %1359 = vmatpush.bf16.msrb.mxu3 %v1922_v57  ;;  %v1910_v63 = vor.u32 %v2098_v61, %v1909_v60 }
 0x358   :  { %v1914_v2 = vor.u32 %v2097_v62, %v1911_v0 }
 0x359   :  { %v875_v5 = vpop.f32.mrf.mxu3  ;;  %v888_v6 = vpop.f32.mrf.mxu2  ;;  %1136 = vmatmul.bf16.vlgmr.msrb.gmra.mxu1 %v928_v3  ;;  %1149 = vmatmul.bf16.vlgmr.msra.gmra.mxu2 %v929_v4 }
 0x35a   :  { %1162 = vmatmul.bf16.vlgmr.msra.gmra.mxu3 %v928_v3  ;;  %1175 = vmatmul.bf16.vlgmr.msra.gmra.mxu0 %v929_v4  ;;  %v962_v3 = vld [vmem:[%s2988_s11 + $0xb] sm:$0x3] }
 0x35b   :  { %1347 = vmatpush.bf16.msrb.mxu2 %v1910_v63  ;;  %1360 = vmatpush.bf16.msrb.mxu3 %v1914_v2  ;;  %v964_v5 = vperm.slane %v962_v3, 0 }
 0x361   :  { %v899_v8 = vpop.f32.mrf.mxu3 }
 0x362   :  { %v900_v9 = vadd.f32 %v899_v8, %v815_v7  ;;  %v965_v7 = vperm.slane %v962_v3, 1 }
 0x364   :  { %vm922_vm10 = vcmp.gt.f32.partialorder %v900_v9, 0.0  ;;  %v923_v10 = vmul.f32 0.01, %v900_v9 }
 0x366   :  { %v924_v11 = vsel %vm922_vm10, %v900_v9, %v923_v10 }
 0x367   :  { %v1180_v12 = vpack.c.bf16 %v924_v11, %v924_v11 }
 0x369   :  { %v901_v13 = vpop.f32.mrf.mxu3  ;;  %1906 = vmatmul.msk.bf16.vlgmr.msra.gmra.mxu1 %vm1217_vm11, %v1180_v12 }
 0x3c9   :  { %v1374_v58 = vpop.xlane.xlu0 %1373 }
 0x3ca   :  { %v1379_v59 = vadd.f32 %v2118_v51, %v1374_v58 }
 0x3cc   :  { %v1380_v1 = vmax.f32 %v1379_v59, 0.0 }
 0x3ce   :  { %1382 = vrot.lane.b32.xlu0 %v1380_v1, %s2120_s15 }
 0x3d6   :  { %v1137_v4 = vpop.f32.mrf.mxu1 }
 0x3d7   :  { %v1176_v6 = vpop.f32.mrf.mxu0  ;;  %v1138_v8 = vadd.f32 %v1137_v4, %v964_v5 }
 0x3dc   :  { %v1150_v9 = vpop.f32.mrf.mxu2 }
 0x3dd   :  { %v1151_v10 = vadd.f32 %v1150_v9, %v1138_v8  ;;  %v1163_v11 = vpop.f32.mrf.mxu3 }
 0x3de   :  { %v1164_v12 = vadd.f32 %v1163_v11, %v965_v7  ;;  %v1139_v13 = vpop.f32.mrf.mxu1 }
 0x3df   :  { %1389 = vst [vmem:[%s2998_s12 + $0x8] sm:$0xff] %v1151_v10  ;;  %v1178_v14 = vpop.f32.mrf.mxu0 }
 0x3e0   :  { %v1177_v15 = vadd.f32 %v1176_v6, %v1164_v12 }
 0x3e2   :  { %1390 = vst [vmem:[%s2998_s12 + $0x10] sm:$0xff] %v1177_v15 }
 0x3e4   :  { %v1152_v17 = vpop.f32.mrf.mxu2 }
 0x3e5   :  { %v1165_v18 = vpop.f32.mrf.mxu3 }
 0x3e6   :  { %v1230_v19 = vpop.f32.mrf.mxu1 }
 0x3e7   :  { %v1231_v20 = vadd.f32 %v2119_v16, %v1230_v19 }
 0x3e9   :  { %vm1234_vm12 = vcmp.gt.f32.partialorder %v1231_v20, 0.0  ;;  %v1235_v21 = vmul.f32 0.01, %v1231_v20 }
 0x3eb   :  { %v1236_v22 = vsel %vm1234_vm12, %v1231_v20, %v1235_v21 }
 0x3ec   :  { %v1237_v23 = vpack.c.bf16 %v1236_v22, %v1236_v22 }
 0x3ee   :  { %v1232_v24 = vpop.f32.mrf.mxu1  ;;  %1348 = vmatmul.bf16.vlgmr.msrb.gmra.mxu2 %v1237_v23  ;;  %1361 = vmatmul.bf16.vlgmr.msrb.gmra.mxu3 %v1237_v23 }
 0x440   :  { %v1383_v25 = vpop.permute.xlu0 %1382 }
 0x441   :  { %v1385_v26 = vsel %vm782_vm4, %v2727_v45, %v1383_v25 }
 0x442   :  { %v1387_v27 = vsel %vm1386_vm13, %v1385_v26, 0.0 }
 0x443   :  { %1388 = vst [vmem:[%s2998_s12] sm:$0xff] %v1387_v27 }
 0x471   :  { %v1349_v31 = vpop.f32.mrf.mxu2  ;;  %v1362_v32 = vpop.f32.mrf.mxu3 }
 0x472   :  { %v1350_v33 = vadd.f32 %v1349_v31, %v1256_v29  ;;  %v1363_v34 = vadd.f32 %v1362_v32, %v1257_v30 }
 0x474   :  { %1391 = vst [vmem:[%s2998_s12 + $0x18] sm:$0xff] %v1350_v33 }
 0x475   :  { %1392 = vst [vmem:[%s2998_s12 + $0x20] sm:$0xff] %v1363_v34 }
 0x479   :  { %v1351_v45 = vpop.f32.mrf.mxu2  ;;  %v1364_v35 = vpop.f32.mrf.mxu3 }

</bundles_post_ra>
